<compile_context>
chip_gen: v7x
topology: tpu7x:2x2x1
jax: 0.10.0
libtpu: 0.0.40
codegen_flags: <defaults>
</compile_context>

<pallas_src>
import functools
import math

import numpy as np
import jax
import jax.numpy as jnp
from jax.experimental import pallas as pl
from jax.experimental.pallas import tpu as pltpu

INPUT_SIZE = 17
OUTPUT_SIZE = 5
HIDDEN = 32          # small "hidden_units" for the example (module default 150)
LAYERS = 3
B, T = 2, 8

# TODO(synk): if HIDDEN is restored to the module default of 150, pad H to 128/256
# in the packed slab so 4H stays a multiple of 128 and gate offsets stay lane-aligned.

# ---- packed-weight slab layout (all rows have 4H = 128 lanes) -------------
DPAD = 24                       # input feature dim 17 zero-padded to 24 (8-aligned)
R_WIH0 = 0                      # (DPAD, 4H)  layer-0 W_ih^T (rows 17..23 zero)
R_WHH0 = R_WIH0 + DPAD          # (H, 4H)     layer-0 W_hh^T
R_W1IH = R_WHH0 + HIDDEN        # (H, 4H)     layer-1 W_ih^T
R_W1HH = R_W1IH + HIDDEN        # (H, 4H)     layer-1 W_hh^T
R_W2IH = R_W1HH + HIDDEN        # (H, 4H)     layer-2 W_ih^T
R_W2HH = R_W2IH + HIDDEN        # (H, 4H)     layer-2 W_hh^T
R_B = R_W2HH + HIDDEN           # rows R_B, R_B+1, R_B+2 = b0, b1, b2 (b_ih + b_hh)
SLAB_ROWS = ((R_B + 3 + 7) // 8) * 8


# ----------------------------------------------------------------------------
# Fused kernel: x (T*B, DPAD) time-major -> probs (T*B, O). Single invocation.
# ----------------------------------------------------------------------------
def fused_lstm_kernel(x_ref, w_ref, head_ref, out_ref, *, Bn, Tn):
    H = HIDDEN
    H4 = 4 * H

    # ---- static slices of the packed slabs (zero runtime cost) -------------
    wih0 = w_ref[R_WIH0:R_WIH0 + DPAD, :]
    whh0 = w_ref[R_WHH0:R_WHH0 + H, :]
    w1ih = w_ref[R_W1IH:R_W1IH + H, :]
    w1hh = w_ref[R_W1HH:R_W1HH + H, :]
    w2ih = w_ref[R_W2IH:R_W2IH + H, :]
    w2hh = w_ref[R_W2HH:R_W2HH + H, :]
    b0 = w_ref[R_B:R_B + 1, :]                                   # (1, 4H)
    # biases for layers 1/2 broadcast once, outside the unrolled loop
    b1 = jnp.broadcast_to(w_ref[R_B + 1:R_B + 2, :], (Bn, H4))
    b2 = jnp.broadcast_to(w_ref[R_B + 2:R_B + 3, :], (Bn, H4))
    wlin = head_ref[0:H, :]                                      # (H, O)
    blin = head_ref[H:H + 1, :]                                  # (1, O)

    # ---- layer-0 input projection for ALL timesteps, time-major ------------
    # One (T*B, DPAD)@(DPAD, 4H) dot, off the serial recurrent chain; bias folded.
    xw0 = jnp.dot(x_ref[...], wih0,
                  preferred_element_type=jnp.float32) + b0       # (T*B, 4H)

    zeros = jnp.zeros((Bn, H), jnp.float32)
    h1 = c1 = h2 = c2 = h3 = c3 = zeros
    # previous-step halves of layer-1/2 pre-activations (h_prev = 0 -> just bias)
    a2 = b1
    a3 = b2
    hs = []

    def cell(pre, c):
        # full-vreg nonlinearities (one sigmoid + one tanh on (B, 4H)), slice after
        sg = jax.nn.sigmoid(pre)
        th = jnp.tanh(pre)
        i_g = sg[:, 0 * H:1 * H]
        f_g = sg[:, 1 * H:2 * H]
        g_g = th[:, 2 * H:3 * H]
        o_g = sg[:, 3 * H:4 * H]
        c_new = f_g * c + i_g * g_g
        return o_g * jnp.tanh(c_new), c_new

    # Fully unrolled recurrence (T tiny, static): only the current-step dots
    # (h1@whh0, h1@w1ih, h2@w2ih) sit on the serial critical path.
    for t in range(Tn):
        # layer 1: contiguous time-major slice of the precomputed projection
        pre1 = xw0[t * Bn:(t + 1) * Bn, :] + jnp.dot(
            h1, whh0, preferred_element_type=jnp.float32)
        h1, c1 = cell(pre1, c1)

        # layer 2: current-step half + previous-step half (a2)
        pre2 = jnp.dot(h1, w1ih, preferred_element_type=jnp.float32) + a2
        h2, c2 = cell(pre2, c2)
        if t + 1 < Tn:   # next step's independent half, issued a full cell early
            a2 = jnp.dot(h2, w1hh, preferred_element_type=jnp.float32) + b1

        # layer 3
        pre3 = jnp.dot(h2, w2ih, preferred_element_type=jnp.float32) + a3
        h3, c3 = cell(pre3, c3)
        if t + 1 < Tn:
            a3 = jnp.dot(h3, w2hh, preferred_element_type=jnp.float32) + b2

        hs.append(h3)

    # ---- batched head: ReLU -> Linear -> softmax -> ONE store ---------------
    h_all = jnp.concatenate(hs, axis=0)                          # (T*B, H) time-major
    logits = jnp.dot(jnp.maximum(h_all, 0.0), wlin,
                     preferred_element_type=jnp.float32) + blin  # (T*B, O)
    m = jnp.max(logits, axis=-1, keepdims=True)
    e = jnp.exp(logits - m)
    out_ref[...] = e / jnp.sum(e, axis=-1, keepdims=True)        # exact normalization


# ----------------------------------------------------------------------------
# Wrapper: (B, T, input_size) -> (B, T, output_size) softmax probs
# ----------------------------------------------------------------------------
@jax.jit
def lstm_model_forward(intrusion, slab_a, slab_b):
    Bn, Tn, D = intrusion.shape
    O = slab_b.shape[-1]
    # time-major flatten + zero-pad feature dim to DPAD (layout plumbing outside kernel)
    x2d = jnp.transpose(intrusion, (1, 0, 2)).reshape(Tn * Bn, D)
    x2d = jnp.pad(x2d, ((0, 0), (0, DPAD - D)))

    kernel = functools.partial(fused_lstm_kernel, Bn=Bn, Tn=Tn)
    out2d = pl.pallas_call(
        kernel,
        out_shape=jax.ShapeDtypeStruct((Tn * Bn, O), jnp.float32),
        in_specs=[pl.BlockSpec(memory_space=pltpu.MemorySpace.VMEM)
                  for _ in range(3)],
        out_specs=pl.BlockSpec(memory_space=pltpu.MemorySpace.VMEM),
    )(x2d, slab_a, slab_b)
    return out2d.reshape(Tn, Bn, O).transpose(1, 0, 2)


# ----------------------------------------------------------------------------
# Deterministic PyTorch-style init (U(-1/sqrt(H), 1/sqrt(H))) + slab packing
# ----------------------------------------------------------------------------
def init_raw_params(key):
    k = 1.0 / math.sqrt(HIDDEN)
    layers = []
    for layer in range(LAYERS):
        d_in = INPUT_SIZE if layer == 0 else HIDDEN
        key, k1, k2, k3, k4 = jax.random.split(key, 5)
        wih = jax.random.uniform(k1, (4 * HIDDEN, d_in), jnp.float32, -k, k)
        whh = jax.random.uniform(k2, (4 * HIDDEN, HIDDEN), jnp.float32, -k, k)
        bih = jax.random.uniform(k3, (4 * HIDDEN,), jnp.float32, -k, k)
        bhh = jax.random.uniform(k4, (4 * HIDDEN,), jnp.float32, -k, k)
        layers.append((wih, whh, bih, bhh))
    key, k5, k6 = jax.random.split(key, 3)
    w_lin = jax.random.uniform(k5, (OUTPUT_SIZE, HIDDEN), jnp.float32, -k, k)
    b_lin = jax.random.uniform(k6, (OUTPUT_SIZE,), jnp.float32, -k, k)
    return layers, (w_lin, b_lin)


def pack_params(layers, head):
    (wih0, whh0, bih0, bhh0) = layers[0]
    (wih1, whh1, bih1, bhh1) = layers[1]
    (wih2, whh2, bih2, bhh2) = layers[2]
    w_lin, b_lin = head
    H4 = 4 * HIDDEN

    wih0_t = jnp.zeros((DPAD, H4), jnp.float32).at[:INPUT_SIZE].set(wih0.T)
    slab_a = jnp.concatenate(
        [wih0_t, whh0.T, wih1.T, whh1.T, wih2.T, whh2.T,
         (bih0 + bhh0)[None, :], (bih1 + bhh1)[None, :], (bih2 + bhh2)[None, :]],
        axis=0)
    slab_a = jnp.pad(slab_a, ((0, SLAB_ROWS - slab_a.shape[0]), (0, 0)))
    slab_b = jnp.concatenate([w_lin.T, b_lin[None, :]], axis=0)   # (H+1, O)
    return slab_a, slab_b


# ----------------------------------------------------------------------------
# Pure-JAX reference (semantics of the PyTorch forward), from raw weights
# ----------------------------------------------------------------------------
def reference_forward(intrusion, layers, head):
    H = HIDDEN
    Bn, Tn, _ = intrusion.shape

    def cell(pre, c):
        i_g = jax.nn.sigmoid(pre[:, :H])
        f_g = jax.nn.sigmoid(pre[:, H:2 * H])
        g_g = jnp.tanh(pre[:, 2 * H:3 * H])
        o_g = jax.nn.sigmoid(pre[:, 3 * H:])
        c_new = f_g * c + i_g * g_g
        return o_g * jnp.tanh(c_new), c_new

    x = intrusion
    for (wih, whh, bih, bhh) in layers:
        h = jnp.zeros((Bn, H), jnp.float32)
        c = jnp.zeros((Bn, H), jnp.float32)
        outs = []
        for t in range(Tn):
            h, c = cell(x[:, t, :] @ wih.T + h @ whh.T + bih + bhh, c)
            outs.append(h)
        x = jnp.stack(outs, axis=1)
    w_lin, b_lin = head
    logits = jnp.maximum(x, 0.0) @ w_lin.T + b_lin
    return jax.nn.softmax(logits, axis=2)


if __name__ == "__main__":
    key = jax.random.PRNGKey(0)
    key, pkey, xkey = jax.random.split(key, 3)
    layers, head = init_raw_params(pkey)
    slab_a, slab_b = pack_params(layers, head)
    intrusion = jax.random.normal(xkey, (B, T, INPUT_SIZE), jnp.float32)

    out = jax.block_until_ready(lstm_model_forward(intrusion, slab_a, slab_b))
    ref = jax.block_until_ready(reference_forward(intrusion, layers, head))

    assert out.shape == (B, T, OUTPUT_SIZE), out.shape
    np.testing.assert_allclose(np.asarray(out), np.asarray(ref),
                               rtol=2e-2, atol=2e-3)
    print("KERNEL_OK")
</pallas_src>

<mosaic_0001>
module attributes {stable_mosaic.version = 11 : i64} {
  func.func @fused_lstm_kernel(%arg0: memref<16x24xf32, #tpu.memory_space<vmem>>, %arg1: memref<192x128xf32, #tpu.memory_space<vmem>>, %arg2: memref<33x5xf32, #tpu.memory_space<vmem>>, %arg3: memref<16x5xf32, #tpu.memory_space<vmem>>) attributes {dimension_semantics = [], scalar_prefetch = 0 : i64, scratch_operands = 0 : i64, tpu.core_type = #tpu.core_type<tc>} {
    %c0 = arith.constant 0 : index
    %c0_0 = arith.constant 0 : index
    %0 = vector.load %arg1[%c0, %c0_0] : memref<192x128xf32, #tpu.memory_space<vmem>>, vector<24x128xf32>
    %c24 = arith.constant 24 : index
    %c0_1 = arith.constant 0 : index
    %1 = vector.load %arg1[%c24, %c0_1] : memref<192x128xf32, #tpu.memory_space<vmem>>, vector<32x128xf32>
    %c56 = arith.constant 56 : index
    %c0_2 = arith.constant 0 : index
    %2 = vector.load %arg1[%c56, %c0_2] : memref<192x128xf32, #tpu.memory_space<vmem>>, vector<32x128xf32>
    %c88 = arith.constant 88 : index
    %c0_3 = arith.constant 0 : index
    %3 = vector.load %arg1[%c88, %c0_3] : memref<192x128xf32, #tpu.memory_space<vmem>>, vector<32x128xf32>
    %c120 = arith.constant 120 : index
    %c0_4 = arith.constant 0 : index
    %4 = vector.load %arg1[%c120, %c0_4] : memref<192x128xf32, #tpu.memory_space<vmem>>, vector<32x128xf32>
    %c152 = arith.constant 152 : index
    %c0_5 = arith.constant 0 : index
    %5 = vector.load %arg1[%c152, %c0_5] : memref<192x128xf32, #tpu.memory_space<vmem>>, vector<32x128xf32>
    %c184 = arith.constant 184 : index
    %c0_6 = arith.constant 0 : index
    %6 = vector.load %arg1[%c184, %c0_6] : memref<192x128xf32, #tpu.memory_space<vmem>>, vector<1x128xf32>
    %c185 = arith.constant 185 : index
    %c0_7 = arith.constant 0 : index
    %7 = vector.load %arg1[%c185, %c0_7] : memref<192x128xf32, #tpu.memory_space<vmem>>, vector<1x128xf32>
    %8 = vector.shape_cast %7 : vector<1x128xf32> to vector<1x128xf32>
    %9 = vector.broadcast %8 : vector<1x128xf32> to vector<2x128xf32>
    %c186 = arith.constant 186 : index
    %c0_8 = arith.constant 0 : index
    %10 = vector.load %arg1[%c186, %c0_8] : memref<192x128xf32, #tpu.memory_space<vmem>>, vector<1x128xf32>
    %11 = vector.shape_cast %10 : vector<1x128xf32> to vector<1x128xf32>
    %12 = vector.broadcast %11 : vector<1x128xf32> to vector<2x128xf32>
    %c0_9 = arith.constant 0 : index
    %c0_10 = arith.constant 0 : index
    %13 = vector.load %arg2[%c0_9, %c0_10] : memref<33x5xf32, #tpu.memory_space<vmem>>, vector<32x5xf32>
    %c32 = arith.constant 32 : index
    %c0_11 = arith.constant 0 : index
    %14 = vector.load %arg2[%c32, %c0_11] : memref<33x5xf32, #tpu.memory_space<vmem>>, vector<1x5xf32>
    %c0_12 = arith.constant 0 : index
    %c0_13 = arith.constant 0 : index
    %15 = vector.load %arg0[%c0_12, %c0_13] : memref<16x24xf32, #tpu.memory_space<vmem>>, vector<16x24xf32>
    %cst = arith.constant dense<0.000000e+00> : vector<16x128xf32>
    %16 = tpu.matmul %15, %0, %cst {dimension_numbers = #tpu.dot_dimension_numbers<[1], [0], [0], [1], [0, 0, 1, 1], [], []>} : vector<16x24xf32>, vector<24x128xf32>, vector<16x128xf32> -> vector<16x128xf32>
    %17 = vector.broadcast %6 : vector<1x128xf32> to vector<16x128xf32>
    %18 = arith.addf %16, %17 : vector<16x128xf32>
    %cst_14 = arith.constant 0.000000e+00 : f32
    %19 = vector.broadcast %cst_14 : f32 to vector<2x32xf32>
    %20 = vector.extract_strided_slice %18 {offsets = [0, 0], sizes = [2, 128], strides = [1, 1]} : vector<16x128xf32> to vector<2x128xf32>
    %cst_15 = arith.constant dense<0.000000e+00> : vector<2x128xf32>
    %21 = tpu.matmul %19, %1, %cst_15 {dimension_numbers = #tpu.dot_dimension_numbers<[1], [0], [0], [1], [0, 0, 1, 1], [], []>} : vector<2x32xf32>, vector<32x128xf32>, vector<2x128xf32> -> vector<2x128xf32>
    %22 = arith.addf %20, %21 : vector<2x128xf32>
    %23 = arith.negf %22 : vector<2x128xf32>
    %24 = math.exp %23 : vector<2x128xf32>
    %cst_16 = arith.constant 1.000000e+00 : f32
    %25 = vector.broadcast %cst_16 : f32 to vector<2x128xf32>
    %26 = arith.addf %25, %24 : vector<2x128xf32>
    %27 = arith.divf %25, %26 : vector<2x128xf32>
    %28 = math.tanh %22 : vector<2x128xf32>
    %29 = vector.extract_strided_slice %27 {offsets = [0, 0], sizes = [2, 32], strides = [1, 1]} : vector<2x128xf32> to vector<2x32xf32>
    %30 = vector.extract_strided_slice %27 {offsets = [0, 32], sizes = [2, 32], strides = [1, 1]} : vector<2x128xf32> to vector<2x32xf32>
    %31 = vector.extract_strided_slice %28 {offsets = [0, 64], sizes = [2, 32], strides = [1, 1]} : vector<2x128xf32> to vector<2x32xf32>
    %32 = vector.extract_strided_slice %27 {offsets = [0, 96], sizes = [2, 32], strides = [1, 1]} : vector<2x128xf32> to vector<2x32xf32>
    %33 = arith.mulf %30, %19 : vector<2x32xf32>
    %34 = arith.mulf %29, %31 : vector<2x32xf32>
    %35 = arith.addf %33, %34 : vector<2x32xf32>
    %36 = math.tanh %35 : vector<2x32xf32>
    %37 = arith.mulf %32, %36 : vector<2x32xf32>
    %cst_17 = arith.constant dense<0.000000e+00> : vector<2x128xf32>
    %38 = tpu.matmul %37, %2, %cst_17 {dimension_numbers = #tpu.dot_dimension_numbers<[1], [0], [0], [1], [0, 0, 1, 1], [], []>} : vector<2x32xf32>, vector<32x128xf32>, vector<2x128xf32> -> vector<2x128xf32>
    %39 = arith.addf %38, %9 : vector<2x128xf32>
    %40 = arith.negf %39 : vector<2x128xf32>
    %41 = math.exp %40 : vector<2x128xf32>
    %cst_18 = arith.constant 1.000000e+00 : f32
    %42 = vector.broadcast %cst_18 : f32 to vector<2x128xf32>
    %43 = arith.addf %42, %41 : vector<2x128xf32>
    %44 = arith.divf %42, %43 : vector<2x128xf32>
    %45 = math.tanh %39 : vector<2x128xf32>
    %46 = vector.extract_strided_slice %44 {offsets = [0, 0], sizes = [2, 32], strides = [1, 1]} : vector<2x128xf32> to vector<2x32xf32>
    %47 = vector.extract_strided_slice %44 {offsets = [0, 32], sizes = [2, 32], strides = [1, 1]} : vector<2x128xf32> to vector<2x32xf32>
    %48 = vector.extract_strided_slice %45 {offsets = [0, 64], sizes = [2, 32], strides = [1, 1]} : vector<2x128xf32> to vector<2x32xf32>
    %49 = vector.extract_strided_slice %44 {offsets = [0, 96], sizes = [2, 32], strides = [1, 1]} : vector<2x128xf32> to vector<2x32xf32>
    %50 = arith.mulf %47, %19 : vector<2x32xf32>
    %51 = arith.mulf %46, %48 : vector<2x32xf32>
    %52 = arith.addf %50, %51 : vector<2x32xf32>
    %53 = math.tanh %52 : vector<2x32xf32>
    %54 = arith.mulf %49, %53 : vector<2x32xf32>
    %cst_19 = arith.constant dense<0.000000e+00> : vector<2x128xf32>
    %55 = tpu.matmul %54, %3, %cst_19 {dimension_numbers = #tpu.dot_dimension_numbers<[1], [0], [0], [1], [0, 0, 1, 1], [], []>} : vector<2x32xf32>, vector<32x128xf32>, vector<2x128xf32> -> vector<2x128xf32>
    %56 = arith.addf %55, %9 : vector<2x128xf32>
    %cst_20 = arith.constant dense<0.000000e+00> : vector<2x128xf32>
    %57 = tpu.matmul %54, %4, %cst_20 {dimension_numbers = #tpu.dot_dimension_numbers<[1], [0], [0], [1], [0, 0, 1, 1], [], []>} : vector<2x32xf32>, vector<32x128xf32>, vector<2x128xf32> -> vector<2x128xf32>
    %58 = arith.addf %57, %12 : vector<2x128xf32>
    %59 = arith.negf %58 : vector<2x128xf32>
    %60 = math.exp %59 : vector<2x128xf32>
    %cst_21 = arith.constant 1.000000e+00 : f32
    %61 = vector.broadcast %cst_21 : f32 to vector<2x128xf32>
    %62 = arith.addf %61, %60 : vector<2x128xf32>
    %63 = arith.divf %61, %62 : vector<2x128xf32>
    %64 = math.tanh %58 : vector<2x128xf32>
    %65 = vector.extract_strided_slice %63 {offsets = [0, 0], sizes = [2, 32], strides = [1, 1]} : vector<2x128xf32> to vector<2x32xf32>
    %66 = vector.extract_strided_slice %63 {offsets = [0, 32], sizes = [2, 32], strides = [1, 1]} : vector<2x128xf32> to vector<2x32xf32>
    %67 = vector.extract_strided_slice %64 {offsets = [0, 64], sizes = [2, 32], strides = [1, 1]} : vector<2x128xf32> to vector<2x32xf32>
    %68 = vector.extract_strided_slice %63 {offsets = [0, 96], sizes = [2, 32], strides = [1, 1]} : vector<2x128xf32> to vector<2x32xf32>
    %69 = arith.mulf %66, %19 : vector<2x32xf32>
    %70 = arith.mulf %65, %67 : vector<2x32xf32>
    %71 = arith.addf %69, %70 : vector<2x32xf32>
    %72 = math.tanh %71 : vector<2x32xf32>
    %73 = arith.mulf %68, %72 : vector<2x32xf32>
    %cst_22 = arith.constant dense<0.000000e+00> : vector<2x128xf32>
    %74 = tpu.matmul %73, %5, %cst_22 {dimension_numbers = #tpu.dot_dimension_numbers<[1], [0], [0], [1], [0, 0, 1, 1], [], []>} : vector<2x32xf32>, vector<32x128xf32>, vector<2x128xf32> -> vector<2x128xf32>
    %75 = arith.addf %74, %12 : vector<2x128xf32>
    %76 = vector.extract_strided_slice %18 {offsets = [2, 0], sizes = [2, 128], strides = [1, 1]} : vector<16x128xf32> to vector<2x128xf32>
    %cst_23 = arith.constant dense<0.000000e+00> : vector<2x128xf32>
    %77 = tpu.matmul %37, %1, %cst_23 {dimension_numbers = #tpu.dot_dimension_numbers<[1], [0], [0], [1], [0, 0, 1, 1], [], []>} : vector<2x32xf32>, vector<32x128xf32>, vector<2x128xf32> -> vector<2x128xf32>
    %78 = arith.addf %76, %77 : vector<2x128xf32>
    %79 = arith.negf %78 : vector<2x128xf32>
    %80 = math.exp %79 : vector<2x128xf32>
    %cst_24 = arith.constant 1.000000e+00 : f32
    %81 = vector.broadcast %cst_24 : f32 to vector<2x128xf32>
    %82 = arith.addf %81, %80 : vector<2x128xf32>
    %83 = arith.divf %81, %82 : vector<2x128xf32>
    %84 = math.tanh %78 : vector<2x128xf32>
    %85 = vector.extract_strided_slice %83 {offsets = [0, 0], sizes = [2, 32], strides = [1, 1]} : vector<2x128xf32> to vector<2x32xf32>
    %86 = vector.extract_strided_slice %83 {offsets = [0, 32], sizes = [2, 32], strides = [1, 1]} : vector<2x128xf32> to vector<2x32xf32>
    %87 = vector.extract_strided_slice %84 {offsets = [0, 64], sizes = [2, 32], strides = [1, 1]} : vector<2x128xf32> to vector<2x32xf32>
    %88 = vector.extract_strided_slice %83 {offsets = [0, 96], sizes = [2, 32], strides = [1, 1]} : vector<2x128xf32> to vector<2x32xf32>
    %89 = arith.mulf %86, %35 : vector<2x32xf32>
    %90 = arith.mulf %85, %87 : vector<2x32xf32>
    %91 = arith.addf %89, %90 : vector<2x32xf32>
    %92 = math.tanh %91 : vector<2x32xf32>
    %93 = arith.mulf %88, %92 : vector<2x32xf32>
    %cst_25 = arith.constant dense<0.000000e+00> : vector<2x128xf32>
    %94 = tpu.matmul %93, %2, %cst_25 {dimension_numbers = #tpu.dot_dimension_numbers<[1], [0], [0], [1], [0, 0, 1, 1], [], []>} : vector<2x32xf32>, vector<32x128xf32>, vector<2x128xf32> -> vector<2x128xf32>
    %95 = arith.addf %94, %56 : vector<2x128xf32>
    %96 = arith.negf %95 : vector<2x128xf32>
    %97 = math.exp %96 : vector<2x128xf32>
    %cst_26 = arith.constant 1.000000e+00 : f32
    %98 = vector.broadcast %cst_26 : f32 to vector<2x128xf32>
    %99 = arith.addf %98, %97 : vector<2x128xf32>
    %100 = arith.divf %98, %99 : vector<2x128xf32>
    %101 = math.tanh %95 : vector<2x128xf32>
    %102 = vector.extract_strided_slice %100 {offsets = [0, 0], sizes = [2, 32], strides = [1, 1]} : vector<2x128xf32> to vector<2x32xf32>
    %103 = vector.extract_strided_slice %100 {offsets = [0, 32], sizes = [2, 32], strides = [1, 1]} : vector<2x128xf32> to vector<2x32xf32>
    %104 = vector.extract_strided_slice %101 {offsets = [0, 64], sizes = [2, 32], strides = [1, 1]} : vector<2x128xf32> to vector<2x32xf32>
    %105 = vector.extract_strided_slice %100 {offsets = [0, 96], sizes = [2, 32], strides = [1, 1]} : vector<2x128xf32> to vector<2x32xf32>
    %106 = arith.mulf %103, %52 : vector<2x32xf32>
    %107 = arith.mulf %102, %104 : vector<2x32xf32>
    %108 = arith.addf %106, %107 : vector<2x32xf32>
    %109 = math.tanh %108 : vector<2x32xf32>
    %110 = arith.mulf %105, %109 : vector<2x32xf32>
    %cst_27 = arith.constant dense<0.000000e+00> : vector<2x128xf32>
    %111 = tpu.matmul %110, %3, %cst_27 {dimension_numbers = #tpu.dot_dimension_numbers<[1], [0], [0], [1], [0, 0, 1, 1], [], []>} : vector<2x32xf32>, vector<32x128xf32>, vector<2x128xf32> -> vector<2x128xf32>
    %112 = arith.addf %111, %9 : vector<2x128xf32>
    %cst_28 = arith.constant dense<0.000000e+00> : vector<2x128xf32>
    %113 = tpu.matmul %110, %4, %cst_28 {dimension_numbers = #tpu.dot_dimension_numbers<[1], [0], [0], [1], [0, 0, 1, 1], [], []>} : vector<2x32xf32>, vector<32x128xf32>, vector<2x128xf32> -> vector<2x128xf32>
    %114 = arith.addf %113, %75 : vector<2x128xf32>
    %115 = arith.negf %114 : vector<2x128xf32>
    %116 = math.exp %115 : vector<2x128xf32>
    %cst_29 = arith.constant 1.000000e+00 : f32
    %117 = vector.broadcast %cst_29 : f32 to vector<2x128xf32>
    %118 = arith.addf %117, %116 : vector<2x128xf32>
    %119 = arith.divf %117, %118 : vector<2x128xf32>
    %120 = math.tanh %114 : vector<2x128xf32>
    %121 = vector.extract_strided_slice %119 {offsets = [0, 0], sizes = [2, 32], strides = [1, 1]} : vector<2x128xf32> to vector<2x32xf32>
    %122 = vector.extract_strided_slice %119 {offsets = [0, 32], sizes = [2, 32], strides = [1, 1]} : vector<2x128xf32> to vector<2x32xf32>
    %123 = vector.extract_strided_slice %120 {offsets = [0, 64], sizes = [2, 32], strides = [1, 1]} : vector<2x128xf32> to vector<2x32xf32>
    %124 = vector.extract_strided_slice %119 {offsets = [0, 96], sizes = [2, 32], strides = [1, 1]} : vector<2x128xf32> to vector<2x32xf32>
    %125 = arith.mulf %122, %71 : vector<2x32xf32>
    %126 = arith.mulf %121, %123 : vector<2x32xf32>
    %127 = arith.addf %125, %126 : vector<2x32xf32>
    %128 = math.tanh %127 : vector<2x32xf32>
    %129 = arith.mulf %124, %128 : vector<2x32xf32>
    %cst_30 = arith.constant dense<0.000000e+00> : vector<2x128xf32>
    %130 = tpu.matmul %129, %5, %cst_30 {dimension_numbers = #tpu.dot_dimension_numbers<[1], [0], [0], [1], [0, 0, 1, 1], [], []>} : vector<2x32xf32>, vector<32x128xf32>, vector<2x128xf32> -> vector<2x128xf32>
    %131 = arith.addf %130, %12 : vector<2x128xf32>
    %132 = vector.extract_strided_slice %18 {offsets = [4, 0], sizes = [2, 128], strides = [1, 1]} : vector<16x128xf32> to vector<2x128xf32>
    %cst_31 = arith.constant dense<0.000000e+00> : vector<2x128xf32>
    %133 = tpu.matmul %93, %1, %cst_31 {dimension_numbers = #tpu.dot_dimension_numbers<[1], [0], [0], [1], [0, 0, 1, 1], [], []>} : vector<2x32xf32>, vector<32x128xf32>, vector<2x128xf32> -> vector<2x128xf32>
    %134 = arith.addf %132, %133 : vector<2x128xf32>
    %135 = arith.negf %134 : vector<2x128xf32>
    %136 = math.exp %135 : vector<2x128xf32>
    %cst_32 = arith.constant 1.000000e+00 : f32
    %137 = vector.broadcast %cst_32 : f32 to vector<2x128xf32>
    %138 = arith.addf %137, %136 : vector<2x128xf32>
    %139 = arith.divf %137, %138 : vector<2x128xf32>
    %140 = math.tanh %134 : vector<2x128xf32>
    %141 = vector.extract_strided_slice %139 {offsets = [0, 0], sizes = [2, 32], strides = [1, 1]} : vector<2x128xf32> to vector<2x32xf32>
    %142 = vector.extract_strided_slice %139 {offsets = [0, 32], sizes = [2, 32], strides = [1, 1]} : vector<2x128xf32> to vector<2x32xf32>
    %143 = vector.extract_strided_slice %140 {offsets = [0, 64], sizes = [2, 32], strides = [1, 1]} : vector<2x128xf32> to vector<2x32xf32>
    %144 = vector.extract_strided_slice %139 {offsets = [0, 96], sizes = [2, 32], strides = [1, 1]} : vector<2x128xf32> to vector<2x32xf32>
    %145 = arith.mulf %142, %91 : vector<2x32xf32>
    %146 = arith.mulf %141, %143 : vector<2x32xf32>
    %147 = arith.addf %145, %146 : vector<2x32xf32>
    %148 = math.tanh %147 : vector<2x32xf32>
    %149 = arith.mulf %144, %148 : vector<2x32xf32>
    %cst_33 = arith.constant dense<0.000000e+00> : vector<2x128xf32>
    %150 = tpu.matmul %149, %2, %cst_33 {dimension_numbers = #tpu.dot_dimension_numbers<[1], [0], [0], [1], [0, 0, 1, 1], [], []>} : vector<2x32xf32>, vector<32x128xf32>, vector<2x128xf32> -> vector<2x128xf32>
    %151 = arith.addf %150, %112 : vector<2x128xf32>
    %152 = arith.negf %151 : vector<2x128xf32>
    %153 = math.exp %152 : vector<2x128xf32>
    %cst_34 = arith.constant 1.000000e+00 : f32
    %154 = vector.broadcast %cst_34 : f32 to vector<2x128xf32>
    %155 = arith.addf %154, %153 : vector<2x128xf32>
    %156 = arith.divf %154, %155 : vector<2x128xf32>
    %157 = math.tanh %151 : vector<2x128xf32>
    %158 = vector.extract_strided_slice %156 {offsets = [0, 0], sizes = [2, 32], strides = [1, 1]} : vector<2x128xf32> to vector<2x32xf32>
    %159 = vector.extract_strided_slice %156 {offsets = [0, 32], sizes = [2, 32], strides = [1, 1]} : vector<2x128xf32> to vector<2x32xf32>
    %160 = vector.extract_strided_slice %157 {offsets = [0, 64], sizes = [2, 32], strides = [1, 1]} : vector<2x128xf32> to vector<2x32xf32>
    %161 = vector.extract_strided_slice %156 {offsets = [0, 96], sizes = [2, 32], strides = [1, 1]} : vector<2x128xf32> to vector<2x32xf32>
    %162 = arith.mulf %159, %108 : vector<2x32xf32>
    %163 = arith.mulf %158, %160 : vector<2x32xf32>
    %164 = arith.addf %162, %163 : vector<2x32xf32>
    %165 = math.tanh %164 : vector<2x32xf32>
    %166 = arith.mulf %161, %165 : vector<2x32xf32>
    %cst_35 = arith.constant dense<0.000000e+00> : vector<2x128xf32>
    %167 = tpu.matmul %166, %3, %cst_35 {dimension_numbers = #tpu.dot_dimension_numbers<[1], [0], [0], [1], [0, 0, 1, 1], [], []>} : vector<2x32xf32>, vector<32x128xf32>, vector<2x128xf32> -> vector<2x128xf32>
    %168 = arith.addf %167, %9 : vector<2x128xf32>
    %cst_36 = arith.constant dense<0.000000e+00> : vector<2x128xf32>
    %169 = tpu.matmul %166, %4, %cst_36 {dimension_numbers = #tpu.dot_dimension_numbers<[1], [0], [0], [1], [0, 0, 1, 1], [], []>} : vector<2x32xf32>, vector<32x128xf32>, vector<2x128xf32> -> vector<2x128xf32>
    %170 = arith.addf %169, %131 : vector<2x128xf32>
    %171 = arith.negf %170 : vector<2x128xf32>
    %172 = math.exp %171 : vector<2x128xf32>
    %cst_37 = arith.constant 1.000000e+00 : f32
    %173 = vector.broadcast %cst_37 : f32 to vector<2x128xf32>
    %174 = arith.addf %173, %172 : vector<2x128xf32>
    %175 = arith.divf %173, %174 : vector<2x128xf32>
    %176 = math.tanh %170 : vector<2x128xf32>
    %177 = vector.extract_strided_slice %175 {offsets = [0, 0], sizes = [2, 32], strides = [1, 1]} : vector<2x128xf32> to vector<2x32xf32>
    %178 = vector.extract_strided_slice %175 {offsets = [0, 32], sizes = [2, 32], strides = [1, 1]} : vector<2x128xf32> to vector<2x32xf32>
    %179 = vector.extract_strided_slice %176 {offsets = [0, 64], sizes = [2, 32], strides = [1, 1]} : vector<2x128xf32> to vector<2x32xf32>
    %180 = vector.extract_strided_slice %175 {offsets = [0, 96], sizes = [2, 32], strides = [1, 1]} : vector<2x128xf32> to vector<2x32xf32>
    %181 = arith.mulf %178, %127 : vector<2x32xf32>
    %182 = arith.mulf %177, %179 : vector<2x32xf32>
    %183 = arith.addf %181, %182 : vector<2x32xf32>
    %184 = math.tanh %183 : vector<2x32xf32>
    %185 = arith.mulf %180, %184 : vector<2x32xf32>
    %cst_38 = arith.constant dense<0.000000e+00> : vector<2x128xf32>
    %186 = tpu.matmul %185, %5, %cst_38 {dimension_numbers = #tpu.dot_dimension_numbers<[1], [0], [0], [1], [0, 0, 1, 1], [], []>} : vector<2x32xf32>, vector<32x128xf32>, vector<2x128xf32> -> vector<2x128xf32>
    %187 = arith.addf %186, %12 : vector<2x128xf32>
    %188 = vector.extract_strided_slice %18 {offsets = [6, 0], sizes = [2, 128], strides = [1, 1]} : vector<16x128xf32> to vector<2x128xf32>
    %cst_39 = arith.constant dense<0.000000e+00> : vector<2x128xf32>
    %189 = tpu.matmul %149, %1, %cst_39 {dimension_numbers = #tpu.dot_dimension_numbers<[1], [0], [0], [1], [0, 0, 1, 1], [], []>} : vector<2x32xf32>, vector<32x128xf32>, vector<2x128xf32> -> vector<2x128xf32>
    %190 = arith.addf %188, %189 : vector<2x128xf32>
    %191 = arith.negf %190 : vector<2x128xf32>
    %192 = math.exp %191 : vector<2x128xf32>
    %cst_40 = arith.constant 1.000000e+00 : f32
    %193 = vector.broadcast %cst_40 : f32 to vector<2x128xf32>
    %194 = arith.addf %193, %192 : vector<2x128xf32>
    %195 = arith.divf %193, %194 : vector<2x128xf32>
    %196 = math.tanh %190 : vector<2x128xf32>
    %197 = vector.extract_strided_slice %195 {offsets = [0, 0], sizes = [2, 32], strides = [1, 1]} : vector<2x128xf32> to vector<2x32xf32>
    %198 = vector.extract_strided_slice %195 {offsets = [0, 32], sizes = [2, 32], strides = [1, 1]} : vector<2x128xf32> to vector<2x32xf32>
    %199 = vector.extract_strided_slice %196 {offsets = [0, 64], sizes = [2, 32], strides = [1, 1]} : vector<2x128xf32> to vector<2x32xf32>
    %200 = vector.extract_strided_slice %195 {offsets = [0, 96], sizes = [2, 32], strides = [1, 1]} : vector<2x128xf32> to vector<2x32xf32>
    %201 = arith.mulf %198, %147 : vector<2x32xf32>
    %202 = arith.mulf %197, %199 : vector<2x32xf32>
    %203 = arith.addf %201, %202 : vector<2x32xf32>
    %204 = math.tanh %203 : vector<2x32xf32>
    %205 = arith.mulf %200, %204 : vector<2x32xf32>
    %cst_41 = arith.constant dense<0.000000e+00> : vector<2x128xf32>
    %206 = tpu.matmul %205, %2, %cst_41 {dimension_numbers = #tpu.dot_dimension_numbers<[1], [0], [0], [1], [0, 0, 1, 1], [], []>} : vector<2x32xf32>, vector<32x128xf32>, vector<2x128xf32> -> vector<2x128xf32>
    %207 = arith.addf %206, %168 : vector<2x128xf32>
    %208 = arith.negf %207 : vector<2x128xf32>
    %209 = math.exp %208 : vector<2x128xf32>
    %cst_42 = arith.constant 1.000000e+00 : f32
    %210 = vector.broadcast %cst_42 : f32 to vector<2x128xf32>
    %211 = arith.addf %210, %209 : vector<2x128xf32>
    %212 = arith.divf %210, %211 : vector<2x128xf32>
    %213 = math.tanh %207 : vector<2x128xf32>
    %214 = vector.extract_strided_slice %212 {offsets = [0, 0], sizes = [2, 32], strides = [1, 1]} : vector<2x128xf32> to vector<2x32xf32>
    %215 = vector.extract_strided_slice %212 {offsets = [0, 32], sizes = [2, 32], strides = [1, 1]} : vector<2x128xf32> to vector<2x32xf32>
    %216 = vector.extract_strided_slice %213 {offsets = [0, 64], sizes = [2, 32], strides = [1, 1]} : vector<2x128xf32> to vector<2x32xf32>
    %217 = vector.extract_strided_slice %212 {offsets = [0, 96], sizes = [2, 32], strides = [1, 1]} : vector<2x128xf32> to vector<2x32xf32>
    %218 = arith.mulf %215, %164 : vector<2x32xf32>
    %219 = arith.mulf %214, %216 : vector<2x32xf32>
    %220 = arith.addf %218, %219 : vector<2x32xf32>
    %221 = math.tanh %220 : vector<2x32xf32>
    %222 = arith.mulf %217, %221 : vector<2x32xf32>
    %cst_43 = arith.constant dense<0.000000e+00> : vector<2x128xf32>
    %223 = tpu.matmul %222, %3, %cst_43 {dimension_numbers = #tpu.dot_dimension_numbers<[1], [0], [0], [1], [0, 0, 1, 1], [], []>} : vector<2x32xf32>, vector<32x128xf32>, vector<2x128xf32> -> vector<2x128xf32>
    %224 = arith.addf %223, %9 : vector<2x128xf32>
    %cst_44 = arith.constant dense<0.000000e+00> : vector<2x128xf32>
    %225 = tpu.matmul %222, %4, %cst_44 {dimension_numbers = #tpu.dot_dimension_numbers<[1], [0], [0], [1], [0, 0, 1, 1], [], []>} : vector<2x32xf32>, vector<32x128xf32>, vector<2x128xf32> -> vector<2x128xf32>
    %226 = arith.addf %225, %187 : vector<2x128xf32>
    %227 = arith.negf %226 : vector<2x128xf32>
    %228 = math.exp %227 : vector<2x128xf32>
    %cst_45 = arith.constant 1.000000e+00 : f32
    %229 = vector.broadcast %cst_45 : f32 to vector<2x128xf32>
    %230 = arith.addf %229, %228 : vector<2x128xf32>
    %231 = arith.divf %229, %230 : vector<2x128xf32>
    %232 = math.tanh %226 : vector<2x128xf32>
    %233 = vector.extract_strided_slice %231 {offsets = [0, 0], sizes = [2, 32], strides = [1, 1]} : vector<2x128xf32> to vector<2x32xf32>
    %234 = vector.extract_strided_slice %231 {offsets = [0, 32], sizes = [2, 32], strides = [1, 1]} : vector<2x128xf32> to vector<2x32xf32>
    %235 = vector.extract_strided_slice %232 {offsets = [0, 64], sizes = [2, 32], strides = [1, 1]} : vector<2x128xf32> to vector<2x32xf32>
    %236 = vector.extract_strided_slice %231 {offsets = [0, 96], sizes = [2, 32], strides = [1, 1]} : vector<2x128xf32> to vector<2x32xf32>
    %237 = arith.mulf %234, %183 : vector<2x32xf32>
    %238 = arith.mulf %233, %235 : vector<2x32xf32>
    %239 = arith.addf %237, %238 : vector<2x32xf32>
    %240 = math.tanh %239 : vector<2x32xf32>
    %241 = arith.mulf %236, %240 : vector<2x32xf32>
    %cst_46 = arith.constant dense<0.000000e+00> : vector<2x128xf32>
    %242 = tpu.matmul %241, %5, %cst_46 {dimension_numbers = #tpu.dot_dimension_numbers<[1], [0], [0], [1], [0, 0, 1, 1], [], []>} : vector<2x32xf32>, vector<32x128xf32>, vector<2x128xf32> -> vector<2x128xf32>
    %243 = arith.addf %242, %12 : vector<2x128xf32>
    %244 = vector.extract_strided_slice %18 {offsets = [8, 0], sizes = [2, 128], strides = [1, 1]} : vector<16x128xf32> to vector<2x128xf32>
    %cst_47 = arith.constant dense<0.000000e+00> : vector<2x128xf32>
    %245 = tpu.matmul %205, %1, %cst_47 {dimension_numbers = #tpu.dot_dimension_numbers<[1], [0], [0], [1], [0, 0, 1, 1], [], []>} : vector<2x32xf32>, vector<32x128xf32>, vector<2x128xf32> -> vector<2x128xf32>
    %246 = arith.addf %244, %245 : vector<2x128xf32>
    %247 = arith.negf %246 : vector<2x128xf32>
    %248 = math.exp %247 : vector<2x128xf32>
    %cst_48 = arith.constant 1.000000e+00 : f32
    %249 = vector.broadcast %cst_48 : f32 to vector<2x128xf32>
    %250 = arith.addf %249, %248 : vector<2x128xf32>
    %251 = arith.divf %249, %250 : vector<2x128xf32>
    %252 = math.tanh %246 : vector<2x128xf32>
    %253 = vector.extract_strided_slice %251 {offsets = [0, 0], sizes = [2, 32], strides = [1, 1]} : vector<2x128xf32> to vector<2x32xf32>
    %254 = vector.extract_strided_slice %251 {offsets = [0, 32], sizes = [2, 32], strides = [1, 1]} : vector<2x128xf32> to vector<2x32xf32>
    %255 = vector.extract_strided_slice %252 {offsets = [0, 64], sizes = [2, 32], strides = [1, 1]} : vector<2x128xf32> to vector<2x32xf32>
    %256 = vector.extract_strided_slice %251 {offsets = [0, 96], sizes = [2, 32], strides = [1, 1]} : vector<2x128xf32> to vector<2x32xf32>
    %257 = arith.mulf %254, %203 : vector<2x32xf32>
    %258 = arith.mulf %253, %255 : vector<2x32xf32>
    %259 = arith.addf %257, %258 : vector<2x32xf32>
    %260 = math.tanh %259 : vector<2x32xf32>
    %261 = arith.mulf %256, %260 : vector<2x32xf32>
    %cst_49 = arith.constant dense<0.000000e+00> : vector<2x128xf32>
    %262 = tpu.matmul %261, %2, %cst_49 {dimension_numbers = #tpu.dot_dimension_numbers<[1], [0], [0], [1], [0, 0, 1, 1], [], []>} : vector<2x32xf32>, vector<32x128xf32>, vector<2x128xf32> -> vector<2x128xf32>
    %263 = arith.addf %262, %224 : vector<2x128xf32>
    %264 = arith.negf %263 : vector<2x128xf32>
    %265 = math.exp %264 : vector<2x128xf32>
    %cst_50 = arith.constant 1.000000e+00 : f32
    %266 = vector.broadcast %cst_50 : f32 to vector<2x128xf32>
    %267 = arith.addf %266, %265 : vector<2x128xf32>
    %268 = arith.divf %266, %267 : vector<2x128xf32>
    %269 = math.tanh %263 : vector<2x128xf32>
    %270 = vector.extract_strided_slice %268 {offsets = [0, 0], sizes = [2, 32], strides = [1, 1]} : vector<2x128xf32> to vector<2x32xf32>
    %271 = vector.extract_strided_slice %268 {offsets = [0, 32], sizes = [2, 32], strides = [1, 1]} : vector<2x128xf32> to vector<2x32xf32>
    %272 = vector.extract_strided_slice %269 {offsets = [0, 64], sizes = [2, 32], strides = [1, 1]} : vector<2x128xf32> to vector<2x32xf32>
    %273 = vector.extract_strided_slice %268 {offsets = [0, 96], sizes = [2, 32], strides = [1, 1]} : vector<2x128xf32> to vector<2x32xf32>
    %274 = arith.mulf %271, %220 : vector<2x32xf32>
    %275 = arith.mulf %270, %272 : vector<2x32xf32>
    %276 = arith.addf %274, %275 : vector<2x32xf32>
    %277 = math.tanh %276 : vector<2x32xf32>
    %278 = arith.mulf %273, %277 : vector<2x32xf32>
    %cst_51 = arith.constant dense<0.000000e+00> : vector<2x128xf32>
    %279 = tpu.matmul %278, %3, %cst_51 {dimension_numbers = #tpu.dot_dimension_numbers<[1], [0], [0], [1], [0, 0, 1, 1], [], []>} : vector<2x32xf32>, vector<32x128xf32>, vector<2x128xf32> -> vector<2x128xf32>
    %280 = arith.addf %279, %9 : vector<2x128xf32>
    %cst_52 = arith.constant dense<0.000000e+00> : vector<2x128xf32>
    %281 = tpu.matmul %278, %4, %cst_52 {dimension_numbers = #tpu.dot_dimension_numbers<[1], [0], [0], [1], [0, 0, 1, 1], [], []>} : vector<2x32xf32>, vector<32x128xf32>, vector<2x128xf32> -> vector<2x128xf32>
    %282 = arith.addf %281, %243 : vector<2x128xf32>
    %283 = arith.negf %282 : vector<2x128xf32>
    %284 = math.exp %283 : vector<2x128xf32>
    %cst_53 = arith.constant 1.000000e+00 : f32
    %285 = vector.broadcast %cst_53 : f32 to vector<2x128xf32>
    %286 = arith.addf %285, %284 : vector<2x128xf32>
    %287 = arith.divf %285, %286 : vector<2x128xf32>
    %288 = math.tanh %282 : vector<2x128xf32>
    %289 = vector.extract_strided_slice %287 {offsets = [0, 0], sizes = [2, 32], strides = [1, 1]} : vector<2x128xf32> to vector<2x32xf32>
    %290 = vector.extract_strided_slice %287 {offsets = [0, 32], sizes = [2, 32], strides = [1, 1]} : vector<2x128xf32> to vector<2x32xf32>
    %291 = vector.extract_strided_slice %288 {offsets = [0, 64], sizes = [2, 32], strides = [1, 1]} : vector<2x128xf32> to vector<2x32xf32>
    %292 = vector.extract_strided_slice %287 {offsets = [0, 96], sizes = [2, 32], strides = [1, 1]} : vector<2x128xf32> to vector<2x32xf32>
    %293 = arith.mulf %290, %239 : vector<2x32xf32>
    %294 = arith.mulf %289, %291 : vector<2x32xf32>
    %295 = arith.addf %293, %294 : vector<2x32xf32>
    %296 = math.tanh %295 : vector<2x32xf32>
    %297 = arith.mulf %292, %296 : vector<2x32xf32>
    %cst_54 = arith.constant dense<0.000000e+00> : vector<2x128xf32>
    %298 = tpu.matmul %297, %5, %cst_54 {dimension_numbers = #tpu.dot_dimension_numbers<[1], [0], [0], [1], [0, 0, 1, 1], [], []>} : vector<2x32xf32>, vector<32x128xf32>, vector<2x128xf32> -> vector<2x128xf32>
    %299 = arith.addf %298, %12 : vector<2x128xf32>
    %300 = vector.extract_strided_slice %18 {offsets = [10, 0], sizes = [2, 128], strides = [1, 1]} : vector<16x128xf32> to vector<2x128xf32>
    %cst_55 = arith.constant dense<0.000000e+00> : vector<2x128xf32>
    %301 = tpu.matmul %261, %1, %cst_55 {dimension_numbers = #tpu.dot_dimension_numbers<[1], [0], [0], [1], [0, 0, 1, 1], [], []>} : vector<2x32xf32>, vector<32x128xf32>, vector<2x128xf32> -> vector<2x128xf32>
    %302 = arith.addf %300, %301 : vector<2x128xf32>
    %303 = arith.negf %302 : vector<2x128xf32>
    %304 = math.exp %303 : vector<2x128xf32>
    %cst_56 = arith.constant 1.000000e+00 : f32
    %305 = vector.broadcast %cst_56 : f32 to vector<2x128xf32>
    %306 = arith.addf %305, %304 : vector<2x128xf32>
    %307 = arith.divf %305, %306 : vector<2x128xf32>
    %308 = math.tanh %302 : vector<2x128xf32>
    %309 = vector.extract_strided_slice %307 {offsets = [0, 0], sizes = [2, 32], strides = [1, 1]} : vector<2x128xf32> to vector<2x32xf32>
    %310 = vector.extract_strided_slice %307 {offsets = [0, 32], sizes = [2, 32], strides = [1, 1]} : vector<2x128xf32> to vector<2x32xf32>
    %311 = vector.extract_strided_slice %308 {offsets = [0, 64], sizes = [2, 32], strides = [1, 1]} : vector<2x128xf32> to vector<2x32xf32>
    %312 = vector.extract_strided_slice %307 {offsets = [0, 96], sizes = [2, 32], strides = [1, 1]} : vector<2x128xf32> to vector<2x32xf32>
    %313 = arith.mulf %310, %259 : vector<2x32xf32>
    %314 = arith.mulf %309, %311 : vector<2x32xf32>
    %315 = arith.addf %313, %314 : vector<2x32xf32>
    %316 = math.tanh %315 : vector<2x32xf32>
    %317 = arith.mulf %312, %316 : vector<2x32xf32>
    %cst_57 = arith.constant dense<0.000000e+00> : vector<2x128xf32>
    %318 = tpu.matmul %317, %2, %cst_57 {dimension_numbers = #tpu.dot_dimension_numbers<[1], [0], [0], [1], [0, 0, 1, 1], [], []>} : vector<2x32xf32>, vector<32x128xf32>, vector<2x128xf32> -> vector<2x128xf32>
    %319 = arith.addf %318, %280 : vector<2x128xf32>
    %320 = arith.negf %319 : vector<2x128xf32>
    %321 = math.exp %320 : vector<2x128xf32>
    %cst_58 = arith.constant 1.000000e+00 : f32
    %322 = vector.broadcast %cst_58 : f32 to vector<2x128xf32>
    %323 = arith.addf %322, %321 : vector<2x128xf32>
    %324 = arith.divf %322, %323 : vector<2x128xf32>
    %325 = math.tanh %319 : vector<2x128xf32>
    %326 = vector.extract_strided_slice %324 {offsets = [0, 0], sizes = [2, 32], strides = [1, 1]} : vector<2x128xf32> to vector<2x32xf32>
    %327 = vector.extract_strided_slice %324 {offsets = [0, 32], sizes = [2, 32], strides = [1, 1]} : vector<2x128xf32> to vector<2x32xf32>
    %328 = vector.extract_strided_slice %325 {offsets = [0, 64], sizes = [2, 32], strides = [1, 1]} : vector<2x128xf32> to vector<2x32xf32>
    %329 = vector.extract_strided_slice %324 {offsets = [0, 96], sizes = [2, 32], strides = [1, 1]} : vector<2x128xf32> to vector<2x32xf32>
    %330 = arith.mulf %327, %276 : vector<2x32xf32>
    %331 = arith.mulf %326, %328 : vector<2x32xf32>
    %332 = arith.addf %330, %331 : vector<2x32xf32>
    %333 = math.tanh %332 : vector<2x32xf32>
    %334 = arith.mulf %329, %333 : vector<2x32xf32>
    %cst_59 = arith.constant dense<0.000000e+00> : vector<2x128xf32>
    %335 = tpu.matmul %334, %3, %cst_59 {dimension_numbers = #tpu.dot_dimension_numbers<[1], [0], [0], [1], [0, 0, 1, 1], [], []>} : vector<2x32xf32>, vector<32x128xf32>, vector<2x128xf32> -> vector<2x128xf32>
    %336 = arith.addf %335, %9 : vector<2x128xf32>
    %cst_60 = arith.constant dense<0.000000e+00> : vector<2x128xf32>
    %337 = tpu.matmul %334, %4, %cst_60 {dimension_numbers = #tpu.dot_dimension_numbers<[1], [0], [0], [1], [0, 0, 1, 1], [], []>} : vector<2x32xf32>, vector<32x128xf32>, vector<2x128xf32> -> vector<2x128xf32>
    %338 = arith.addf %337, %299 : vector<2x128xf32>
    %339 = arith.negf %338 : vector<2x128xf32>
    %340 = math.exp %339 : vector<2x128xf32>
    %cst_61 = arith.constant 1.000000e+00 : f32
    %341 = vector.broadcast %cst_61 : f32 to vector<2x128xf32>
    %342 = arith.addf %341, %340 : vector<2x128xf32>
    %343 = arith.divf %341, %342 : vector<2x128xf32>
    %344 = math.tanh %338 : vector<2x128xf32>
    %345 = vector.extract_strided_slice %343 {offsets = [0, 0], sizes = [2, 32], strides = [1, 1]} : vector<2x128xf32> to vector<2x32xf32>
    %346 = vector.extract_strided_slice %343 {offsets = [0, 32], sizes = [2, 32], strides = [1, 1]} : vector<2x128xf32> to vector<2x32xf32>
    %347 = vector.extract_strided_slice %344 {offsets = [0, 64], sizes = [2, 32], strides = [1, 1]} : vector<2x128xf32> to vector<2x32xf32>
    %348 = vector.extract_strided_slice %343 {offsets = [0, 96], sizes = [2, 32], strides = [1, 1]} : vector<2x128xf32> to vector<2x32xf32>
    %349 = arith.mulf %346, %295 : vector<2x32xf32>
    %350 = arith.mulf %345, %347 : vector<2x32xf32>
    %351 = arith.addf %349, %350 : vector<2x32xf32>
    %352 = math.tanh %351 : vector<2x32xf32>
    %353 = arith.mulf %348, %352 : vector<2x32xf32>
    %cst_62 = arith.constant dense<0.000000e+00> : vector<2x128xf32>
    %354 = tpu.matmul %353, %5, %cst_62 {dimension_numbers = #tpu.dot_dimension_numbers<[1], [0], [0], [1], [0, 0, 1, 1], [], []>} : vector<2x32xf32>, vector<32x128xf32>, vector<2x128xf32> -> vector<2x128xf32>
    %355 = arith.addf %354, %12 : vector<2x128xf32>
    %356 = vector.extract_strided_slice %18 {offsets = [12, 0], sizes = [2, 128], strides = [1, 1]} : vector<16x128xf32> to vector<2x128xf32>
    %cst_63 = arith.constant dense<0.000000e+00> : vector<2x128xf32>
    %357 = tpu.matmul %317, %1, %cst_63 {dimension_numbers = #tpu.dot_dimension_numbers<[1], [0], [0], [1], [0, 0, 1, 1], [], []>} : vector<2x32xf32>, vector<32x128xf32>, vector<2x128xf32> -> vector<2x128xf32>
    %358 = arith.addf %356, %357 : vector<2x128xf32>
    %359 = arith.negf %358 : vector<2x128xf32>
    %360 = math.exp %359 : vector<2x128xf32>
    %cst_64 = arith.constant 1.000000e+00 : f32
    %361 = vector.broadcast %cst_64 : f32 to vector<2x128xf32>
    %362 = arith.addf %361, %360 : vector<2x128xf32>
    %363 = arith.divf %361, %362 : vector<2x128xf32>
    %364 = math.tanh %358 : vector<2x128xf32>
    %365 = vector.extract_strided_slice %363 {offsets = [0, 0], sizes = [2, 32], strides = [1, 1]} : vector<2x128xf32> to vector<2x32xf32>
    %366 = vector.extract_strided_slice %363 {offsets = [0, 32], sizes = [2, 32], strides = [1, 1]} : vector<2x128xf32> to vector<2x32xf32>
    %367 = vector.extract_strided_slice %364 {offsets = [0, 64], sizes = [2, 32], strides = [1, 1]} : vector<2x128xf32> to vector<2x32xf32>
    %368 = vector.extract_strided_slice %363 {offsets = [0, 96], sizes = [2, 32], strides = [1, 1]} : vector<2x128xf32> to vector<2x32xf32>
    %369 = arith.mulf %366, %315 : vector<2x32xf32>
    %370 = arith.mulf %365, %367 : vector<2x32xf32>
    %371 = arith.addf %369, %370 : vector<2x32xf32>
    %372 = math.tanh %371 : vector<2x32xf32>
    %373 = arith.mulf %368, %372 : vector<2x32xf32>
    %cst_65 = arith.constant dense<0.000000e+00> : vector<2x128xf32>
    %374 = tpu.matmul %373, %2, %cst_65 {dimension_numbers = #tpu.dot_dimension_numbers<[1], [0], [0], [1], [0, 0, 1, 1], [], []>} : vector<2x32xf32>, vector<32x128xf32>, vector<2x128xf32> -> vector<2x128xf32>
    %375 = arith.addf %374, %336 : vector<2x128xf32>
    %376 = arith.negf %375 : vector<2x128xf32>
    %377 = math.exp %376 : vector<2x128xf32>
    %cst_66 = arith.constant 1.000000e+00 : f32
    %378 = vector.broadcast %cst_66 : f32 to vector<2x128xf32>
    %379 = arith.addf %378, %377 : vector<2x128xf32>
    %380 = arith.divf %378, %379 : vector<2x128xf32>
    %381 = math.tanh %375 : vector<2x128xf32>
    %382 = vector.extract_strided_slice %380 {offsets = [0, 0], sizes = [2, 32], strides = [1, 1]} : vector<2x128xf32> to vector<2x32xf32>
    %383 = vector.extract_strided_slice %380 {offsets = [0, 32], sizes = [2, 32], strides = [1, 1]} : vector<2x128xf32> to vector<2x32xf32>
    %384 = vector.extract_strided_slice %381 {offsets = [0, 64], sizes = [2, 32], strides = [1, 1]} : vector<2x128xf32> to vector<2x32xf32>
    %385 = vector.extract_strided_slice %380 {offsets = [0, 96], sizes = [2, 32], strides = [1, 1]} : vector<2x128xf32> to vector<2x32xf32>
    %386 = arith.mulf %383, %332 : vector<2x32xf32>
    %387 = arith.mulf %382, %384 : vector<2x32xf32>
    %388 = arith.addf %386, %387 : vector<2x32xf32>
    %389 = math.tanh %388 : vector<2x32xf32>
    %390 = arith.mulf %385, %389 : vector<2x32xf32>
    %cst_67 = arith.constant dense<0.000000e+00> : vector<2x128xf32>
    %391 = tpu.matmul %390, %3, %cst_67 {dimension_numbers = #tpu.dot_dimension_numbers<[1], [0], [0], [1], [0, 0, 1, 1], [], []>} : vector<2x32xf32>, vector<32x128xf32>, vector<2x128xf32> -> vector<2x128xf32>
    %392 = arith.addf %391, %9 : vector<2x128xf32>
    %cst_68 = arith.constant dense<0.000000e+00> : vector<2x128xf32>
    %393 = tpu.matmul %390, %4, %cst_68 {dimension_numbers = #tpu.dot_dimension_numbers<[1], [0], [0], [1], [0, 0, 1, 1], [], []>} : vector<2x32xf32>, vector<32x128xf32>, vector<2x128xf32> -> vector<2x128xf32>
    %394 = arith.addf %393, %355 : vector<2x128xf32>
    %395 = arith.negf %394 : vector<2x128xf32>
    %396 = math.exp %395 : vector<2x128xf32>
    %cst_69 = arith.constant 1.000000e+00 : f32
    %397 = vector.broadcast %cst_69 : f32 to vector<2x128xf32>
    %398 = arith.addf %397, %396 : vector<2x128xf32>
    %399 = arith.divf %397, %398 : vector<2x128xf32>
    %400 = math.tanh %394 : vector<2x128xf32>
    %401 = vector.extract_strided_slice %399 {offsets = [0, 0], sizes = [2, 32], strides = [1, 1]} : vector<2x128xf32> to vector<2x32xf32>
    %402 = vector.extract_strided_slice %399 {offsets = [0, 32], sizes = [2, 32], strides = [1, 1]} : vector<2x128xf32> to vector<2x32xf32>
    %403 = vector.extract_strided_slice %400 {offsets = [0, 64], sizes = [2, 32], strides = [1, 1]} : vector<2x128xf32> to vector<2x32xf32>
    %404 = vector.extract_strided_slice %399 {offsets = [0, 96], sizes = [2, 32], strides = [1, 1]} : vector<2x128xf32> to vector<2x32xf32>
    %405 = arith.mulf %402, %351 : vector<2x32xf32>
    %406 = arith.mulf %401, %403 : vector<2x32xf32>
    %407 = arith.addf %405, %406 : vector<2x32xf32>
    %408 = math.tanh %407 : vector<2x32xf32>
    %409 = arith.mulf %404, %408 : vector<2x32xf32>
    %cst_70 = arith.constant dense<0.000000e+00> : vector<2x128xf32>
    %410 = tpu.matmul %409, %5, %cst_70 {dimension_numbers = #tpu.dot_dimension_numbers<[1], [0], [0], [1], [0, 0, 1, 1], [], []>} : vector<2x32xf32>, vector<32x128xf32>, vector<2x128xf32> -> vector<2x128xf32>
    %411 = arith.addf %410, %12 : vector<2x128xf32>
    %412 = vector.extract_strided_slice %18 {offsets = [14, 0], sizes = [2, 128], strides = [1, 1]} : vector<16x128xf32> to vector<2x128xf32>
    %cst_71 = arith.constant dense<0.000000e+00> : vector<2x128xf32>
    %413 = tpu.matmul %373, %1, %cst_71 {dimension_numbers = #tpu.dot_dimension_numbers<[1], [0], [0], [1], [0, 0, 1, 1], [], []>} : vector<2x32xf32>, vector<32x128xf32>, vector<2x128xf32> -> vector<2x128xf32>
    %414 = arith.addf %412, %413 : vector<2x128xf32>
    %415 = arith.negf %414 : vector<2x128xf32>
    %416 = math.exp %415 : vector<2x128xf32>
    %cst_72 = arith.constant 1.000000e+00 : f32
    %417 = vector.broadcast %cst_72 : f32 to vector<2x128xf32>
    %418 = arith.addf %417, %416 : vector<2x128xf32>
    %419 = arith.divf %417, %418 : vector<2x128xf32>
    %420 = math.tanh %414 : vector<2x128xf32>
    %421 = vector.extract_strided_slice %419 {offsets = [0, 0], sizes = [2, 32], strides = [1, 1]} : vector<2x128xf32> to vector<2x32xf32>
    %422 = vector.extract_strided_slice %419 {offsets = [0, 32], sizes = [2, 32], strides = [1, 1]} : vector<2x128xf32> to vector<2x32xf32>
    %423 = vector.extract_strided_slice %420 {offsets = [0, 64], sizes = [2, 32], strides = [1, 1]} : vector<2x128xf32> to vector<2x32xf32>
    %424 = vector.extract_strided_slice %419 {offsets = [0, 96], sizes = [2, 32], strides = [1, 1]} : vector<2x128xf32> to vector<2x32xf32>
    %425 = arith.mulf %422, %371 : vector<2x32xf32>
    %426 = arith.mulf %421, %423 : vector<2x32xf32>
    %427 = arith.addf %425, %426 : vector<2x32xf32>
    %428 = math.tanh %427 : vector<2x32xf32>
    %429 = arith.mulf %424, %428 : vector<2x32xf32>
    %cst_73 = arith.constant dense<0.000000e+00> : vector<2x128xf32>
    %430 = tpu.matmul %429, %2, %cst_73 {dimension_numbers = #tpu.dot_dimension_numbers<[1], [0], [0], [1], [0, 0, 1, 1], [], []>} : vector<2x32xf32>, vector<32x128xf32>, vector<2x128xf32> -> vector<2x128xf32>
    %431 = arith.addf %430, %392 : vector<2x128xf32>
    %432 = arith.negf %431 : vector<2x128xf32>
    %433 = math.exp %432 : vector<2x128xf32>
    %cst_74 = arith.constant 1.000000e+00 : f32
    %434 = vector.broadcast %cst_74 : f32 to vector<2x128xf32>
    %435 = arith.addf %434, %433 : vector<2x128xf32>
    %436 = arith.divf %434, %435 : vector<2x128xf32>
    %437 = math.tanh %431 : vector<2x128xf32>
    %438 = vector.extract_strided_slice %436 {offsets = [0, 0], sizes = [2, 32], strides = [1, 1]} : vector<2x128xf32> to vector<2x32xf32>
    %439 = vector.extract_strided_slice %436 {offsets = [0, 32], sizes = [2, 32], strides = [1, 1]} : vector<2x128xf32> to vector<2x32xf32>
    %440 = vector.extract_strided_slice %437 {offsets = [0, 64], sizes = [2, 32], strides = [1, 1]} : vector<2x128xf32> to vector<2x32xf32>
    %441 = vector.extract_strided_slice %436 {offsets = [0, 96], sizes = [2, 32], strides = [1, 1]} : vector<2x128xf32> to vector<2x32xf32>
    %442 = arith.mulf %439, %388 : vector<2x32xf32>
    %443 = arith.mulf %438, %440 : vector<2x32xf32>
    %444 = arith.addf %442, %443 : vector<2x32xf32>
    %445 = math.tanh %444 : vector<2x32xf32>
    %446 = arith.mulf %441, %445 : vector<2x32xf32>
    %cst_75 = arith.constant dense<0.000000e+00> : vector<2x128xf32>
    %447 = tpu.matmul %446, %4, %cst_75 {dimension_numbers = #tpu.dot_dimension_numbers<[1], [0], [0], [1], [0, 0, 1, 1], [], []>} : vector<2x32xf32>, vector<32x128xf32>, vector<2x128xf32> -> vector<2x128xf32>
    %448 = arith.addf %447, %411 : vector<2x128xf32>
    %449 = arith.negf %448 : vector<2x128xf32>
    %450 = math.exp %449 : vector<2x128xf32>
    %cst_76 = arith.constant 1.000000e+00 : f32
    %451 = vector.broadcast %cst_76 : f32 to vector<2x128xf32>
    %452 = arith.addf %451, %450 : vector<2x128xf32>
    %453 = arith.divf %451, %452 : vector<2x128xf32>
    %454 = math.tanh %448 : vector<2x128xf32>
    %455 = vector.extract_strided_slice %453 {offsets = [0, 0], sizes = [2, 32], strides = [1, 1]} : vector<2x128xf32> to vector<2x32xf32>
    %456 = vector.extract_strided_slice %453 {offsets = [0, 32], sizes = [2, 32], strides = [1, 1]} : vector<2x128xf32> to vector<2x32xf32>
    %457 = vector.extract_strided_slice %454 {offsets = [0, 64], sizes = [2, 32], strides = [1, 1]} : vector<2x128xf32> to vector<2x32xf32>
    %458 = vector.extract_strided_slice %453 {offsets = [0, 96], sizes = [2, 32], strides = [1, 1]} : vector<2x128xf32> to vector<2x32xf32>
    %459 = arith.mulf %456, %407 : vector<2x32xf32>
    %460 = arith.mulf %455, %457 : vector<2x32xf32>
    %461 = arith.addf %459, %460 : vector<2x32xf32>
    %462 = math.tanh %461 : vector<2x32xf32>
    %463 = arith.mulf %458, %462 : vector<2x32xf32>
    %464 = tpu.concatenate %73, %129, %185, %241, %297, %353, %409, %463 in 0 : vector<2x32xf32>, vector<2x32xf32>, vector<2x32xf32>, vector<2x32xf32>, vector<2x32xf32>, vector<2x32xf32>, vector<2x32xf32>, vector<2x32xf32> -> vector<16x32xf32>
    %cst_77 = arith.constant 0.000000e+00 : f32
    %465 = vector.broadcast %cst_77 : f32 to vector<16x32xf32>
    %466 = arith.maximumf %464, %465 : vector<16x32xf32>
    %cst_78 = arith.constant dense<0.000000e+00> : vector<16x5xf32>
    %467 = tpu.matmul %466, %13, %cst_78 {dimension_numbers = #tpu.dot_dimension_numbers<[1], [0], [0], [1], [0, 0, 1, 1], [], []>} : vector<16x32xf32>, vector<32x5xf32>, vector<16x5xf32> -> vector<16x5xf32>
    %468 = vector.broadcast %14 : vector<1x5xf32> to vector<16x5xf32>
    %469 = arith.addf %467, %468 : vector<16x5xf32>
    %cst_79 = arith.constant dense<0xFF800000> : vector<16xf32>
    %470 = vector.multi_reduction <maximumf>, %469, %cst_79 [1] : vector<16x5xf32> to vector<16xf32>
    %471 = vector.shape_cast %470 : vector<16xf32> to vector<16x1xf32>
    %472 = vector.broadcast %471 : vector<16x1xf32> to vector<16x5xf32>
    %473 = arith.subf %469, %472 : vector<16x5xf32>
    %474 = math.exp %473 : vector<16x5xf32>
    %cst_80 = arith.constant dense<0.000000e+00> : vector<16xf32>
    %475 = vector.multi_reduction <add>, %474, %cst_80 [1] : vector<16x5xf32> to vector<16xf32>
    %476 = vector.shape_cast %475 : vector<16xf32> to vector<16x1xf32>
    %477 = vector.broadcast %476 : vector<16x1xf32> to vector<16x5xf32>
    %478 = arith.divf %474, %477 : vector<16x5xf32>
    %c0_81 = arith.constant 0 : index
    %c0_82 = arith.constant 0 : index
    %479 = vector.load %arg3[%c0_81, %c0_82] : memref<16x5xf32, #tpu.memory_space<vmem>>, vector<16x5xf32>
    tpu.vector_store %arg3[%c0_81, %c0_82], %478 {strides = array<i32>} : memref<16x5xf32, #tpu.memory_space<vmem>>, vector<16x5xf32>,
    return
  }
}

</mosaic_0001>

<bundles_post_ra>
// kernel: lstm_model_forward.1
= control target key start
LH: loop header
LB: loop body
LE: loop exit
PB: predicated region body
PF: predicated region fallthrough
CT: control target
= control target key end

     0   :  { %8 = vsyncpa [#allocation3], 0  ;;  %s4930_s12 = smov [#allocation2]   ;;  %s5541_s0 = inlined_call_operand.vmem [shape: f32[16,24], index: 0, kind: input, shape index: {}]   ;;  %s5542_s1 = inlined_call_operand.hbm [shape: f32[192,128], index: 1, kind: input, shape index: {}]   ;;  %s5543_s2 = inlined_call_operand.vmem [shape: f32[33,5], index: 2, kind: input, shape index: {}]   ;;  %s5544_s3 = inlined_call_operand.vmem [shape: f32[16,5], index: 3, kind: output, shape index: {}]  }
   0x1   :  { %s16_s13 = sshll.u32 %s4930_s12, 4  ;;  %s4906_s16 = scalar_lea.hbm %s5542_s1, 3072  ;;  %s17_s13 = int_to_ptr.vmem [resolvable:$true] %s16_s13 }
   0x2   :  { %p4907_p0 = scmp.ne.s32.totalorder %s5542_s1, %s4906_s16  ;;  %p4910_p1 = scmp.lt.u32.totalorder %s4906_s16, %s5542_s1 }
   0x4   :  { %p4912_p2 = pnand %p4910_p1, %p4907_p0 }
   0x6   :  { %4915 = shalt.err (!%p4912_p2)
}
   0x7   :  { %s4916_s21 = scalar_lea.vmem %s17_s13, 3072  ;;  %p4921_p4 = scmp.lt.s32.totalorder %s17_s13, %s17_s13 }
   0x8   :  { %p4917_p3 = scmp.ne.s32.totalorder %s17_s13, %s4916_s21  ;;  %p4922_p5 = scmp.lt.s32.totalorder %s4916_s21, %s4916_s21 }
   0xa   :  { %p4923_p6 = por %p4922_p5, %p4921_p4 }
   0xc   :  { %p4924_p7 = pnand %p4923_p6, %p4917_p3 }
   0xe   :  { %4927 = shalt.err (!%p4924_p7)
}
   0xf   :  { %s4931_s22 = smov 128   ;;  %s4932_s23 = smov 8  }
  0x10   :  { %22 = dma.hbm_to_vmem [thread:$0]  %s5542_s1, 3072, %s17_s13, [#allocation3], %s4931_s22, %s4931_s22, %s4932_s23  }
  0x11   :  { %4928 = dma.done.wait [#allocation3], 3072  }
  0x12   :  { %4929 = vsyncadd [#allocation3], 4294964224  ;;  %v4933_v0 = vmov 0.0|0.0   ;;  %vm4934_vm0 = vmmov 0   ;;  %v4935_v1 = vmov 0.0   ;;  %vm73_vm1 = vcmask 195584  }
  0x13   :  { %4418 = vmatprep.subr.bf16.mxu1 %v4933_v0  ;;  %3993 = vmatprep.mubr.msk.f32.mxu1 %vm4934_vm0, %v4935_v1  ;;  %v28_v2 = vld [vmem:[#allocation2] sm:$0xff]  ;;  %v29_v3 = vld [vmem:[#allocation2 + $0x8] sm:$0xff]  ;;  %v31_v4 = vld [vmem:[#allocation2 + $0x18] sm:$0xff]  ;;  %s4937_s29 = smov 32   ;;  %vm155_vm2 = vcmask 261120   ;;  %vm3576_vm3 = vcmask 1041408  }
  0x14   :  { %v4414_v5 = vpack.c.bf16 %v29_v3, %v28_v2  ;;  %v32_v6 = vld [vmem:[#allocation2 + $0x20] sm:$0xff]  ;;  %v30_v9 = vld [vmem:[#allocation2 + $0x10] sm:$0xff]  ;;  %v33_v10 = vld [vmem:[#allocation2 + $0x28] sm:$0xff]  ;;  %vm3578_vm4 = vcmask 1043456   ;;  %vm3580_vm5 = vcmask 1045504   ;;  %vm3676_vm6 = vcmask 39936  }
  0x15   :  { %v67_v7 = vld [vmem:[%s5541_s0] sm:$0xff]  ;;  %v4976_v8 = vpack.c.bf16 %v32_v6, %v31_v4  ;;  %v34_v11 = vld [vmem:[#allocation2 + $0x30] sm:$0xff]  ;;  %v68_v13 = vld [vmem:[%s5541_s0 + $0x8] sm:$0xff]  ;;  %s4936_s0 = smov 64  }
  0x16   :  { %3982 = vmatprep.mubr.msk.f32.mxu0 %vm73_vm1, %v67_v7  ;;  %4415 = vmatprep.subr.bf16.mxu0 %v4414_v5  ;;  %v4980_v12 = vpack.c.bf16 %v34_v11, %v33_v10  ;;  %v3708_v14 = vld [vmem:[#allocation2 + $0xb8] ss:$0 sm:$0xff]  ;;  %v36_v33 = vld [vmem:[#allocation2 + $0x40] sm:$0xff]  ;;  %v37_v34 = vld [vmem:[#allocation2 + $0x48] sm:$0xff] }
  0x17   :  { %4417 = vmatpush3.bf16.msra.mxu0 %v4414_v5  ;;  %4420 = vmatpush3.bf16.msra.mxu1 %v4976_v8  ;;  %v35_v32 = vld [vmem:[#allocation2 + $0x38] sm:$0xff]  ;;  %v38_v36 = vld [vmem:[#allocation2 + $0x50] sm:$0xff]  ;;  %v44_v57 = vld [vmem:[#allocation2 + $0x80] sm:$0xff] }
  0x18   :  { %3980 = vmatprep.subr.mxu0 %v30_v9  ;;  %4421 = vmatprep.subr.bf16.mxu1 %v4933_v0  ;;  %v5005_v35 = vpack.c.bf16 %v36_v33, %v35_v32  ;;  %v5008_v37 = vpack.c.bf16 %v38_v36, %v37_v34  ;;  %v5018_v42 = vld [vmem:[#allocation2 + $0xb9] ss:$0 sm:$0xff]  ;;  %v40_v60 = vld [vmem:[#allocation2 + $0x60] sm:$0xff]  ;;  %v45_v61 = vld [vmem:[#allocation2 + $0x88] sm:$0xff] }
  0x19   :  { %v43_v56 = vld [vmem:[#allocation2 + $0x78] sm:$0xff]  ;;  %v46_v62 = vld [vmem:[#allocation2 + $0x90] sm:$0xff]  ;;  %v41_v2 = vld [vmem:[#allocation2 + $0x68] sm:$0xff] }
  0x1a   :  { %v39_v58 = vld [vmem:[#allocation2 + $0x58] sm:$0xff]  ;;  %v5026_v59 = vpack.c.bf16 %v44_v57, %v43_v56  ;;  %v42_v3 = vld [vmem:[#allocation2 + $0x70] sm:$0xff]  ;;  %v5031_v4 = vpack.c.bf16 %v46_v62, %v45_v61 }
  0x1b   :  { %3981 = vmatpush3.msra.mxu0 %v30_v9  ;;  %4423 = vmatpush3.bf16.msra.mxu1 %v4980_v12  ;;  %v5028_v63 = vpack.c.bf16 %v40_v60, %v39_v58  ;;  %v5035_v5 = vpack.c.bf16 %v42_v3, %v41_v2  ;;  %v5061_v11 = vld [vmem:[#allocation2 + $0xba] ss:$0 sm:$0xff] }
  0x1c   :  { %3983 = vmatmul.mubr.msk.f32.vlgmr.msra.gmra.mrb[0].mxu0 %vm73_vm1, %v68_v13  ;;  %4424 = vmatprep.subr.bf16.mxu0 %v4933_v0 }
  0x1d   :  { %4004 = vmatprep.mubr.msk.f32.mxu0 %vm4934_vm0, %v4935_v1  ;;  %4430 = vmatprep.subr.bf16.mxu1 %v4933_v0 }
  0x1e   :  { %3994 = vmatmul.mubr.f32.vlgmr.msra.gmra.mrb[0].mxu1 %v4935_v1  ;;  %4426 = vmatpush3.bf16.msra.mxu0 %v5005_v35 }
  0x1f   :  { %4015 = vmatprep.mubr.msk.f32.mxu1 %vm4934_vm0, %v4935_v1  ;;  %4427 = vmatprep.subr.bf16.mxu0 %v4933_v0 }
  0x20   :  { %4432 = vmatpush3.bf16.msra.mxu1 %v5028_v63 }
  0x21   :  { %4433 = vmatprep.subr.bf16.mxu1 %v4933_v0 }
  0x22   :  { %4429 = vmatpush3.bf16.msra.mxu0 %v5008_v37 }
  0x23   :  { %4436 = vmatprep.subr.bf16.mxu0 %v4933_v0 }
  0x24   :  { %4435 = vmatpush3.bf16.msra.mxu1 %v5035_v5 }
  0x25   :  { %4442 = vmatprep.subr.bf16.mxu1 %v4933_v0 }
  0xef   :  { %v3984_v15 = vpop.f32.mrb[0].mxu0 }
  0xf0   :  { %v4995_v16 = vadd.f32 %v3984_v15, %v3708_v14  ;;  %v146_v17 = vpop.f32.mrb[1].mxu0 }
  0xf1   :  { %v4997_v18 = vadd.f32 %v3708_v14, %v146_v17  ;;  %v225_v19 = vpop.f32.mrb[0].mxu1 }
  0xf2   :  { %v3995_v20 = vpop.f32.mrb[1].mxu1 }
  0xf3   :  { %v229_v21 = vadd.f32 %v225_v19, %v4997_v18 }
  0xf5   :  { %4704 = vtanh.f32 %v229_v21  ;;  %v3711_v23 = vmul.f32 -1.442695, %v229_v21 }
  0xf7   :  { %4706 = vpow2.f32 %v3711_v23 }
  0xff   :  { %v4705_v22 = vpop.eup %4704 }
 0x100   :  { %239 = vrot.lane.b32.xlu0 %v4705_v22, %s4936_s0 }
 0x101   :  { %v4707_v24 = vpop.eup %4706 }
 0x102   :  { %v233_v25 = vadd.f32 1.0, %v4707_v24 }
 0x104   :  { %4708 = vrcp.f32 %v233_v25 }
 0x10e   :  { %v4709_v26 = vpop.eup %4708 }
 0x10f   :  { %v237_v29 = vmul.f32 0.0, %v4709_v26 }
 0x172   :  { %v240_v27 = vpop.permute.xlu0 %239 }
 0x173   :  { %v242_v28 = vmul.f32 %v4709_v26, %v240_v27 }
 0x175   :  { %244 = vrot.lane.b32.xlu0 %v242_v28, %s4937_s29 }
 0x1e7   :  { %v245_v30 = vpop.permute.xlu0 %244 }
 0x1e8   :  { %v5002_v31 = vadd.f32 %v245_v30, %v237_v29 }
 0x1ea   :  { %4710 = vtanh.f32 %v5002_v31 }
 0x1f4   :  { %v4711_v38 = vpop.eup %4710 }
 0x1f5   :  { %250 = vrot.lane.b32.xlu1 %v4711_v38, %s4936_s0 }
 0x267   :  { %v251_v39 = vpop.permute.xlu1 %250 }
 0x268   :  { %v253_v40 = vmul.f32 %v4709_v26, %v251_v39 }
 0x26a   :  { %255 = vrot.lane.b32.xlu1 %v253_v40, %s4937_s29 }
 0x2dc   :  { %v256_v41 = vpop.permute.xlu1 %255 }
 0x2dd   :  { %4005 = vmatmul.mubr.msk.f32.vlgmr.msra.gmra.mrb[2].mxu0 %vm155_vm2, %v256_v41 }
 0x2de   :  { %4026 = vmatprep.mubr.msk.f32.mxu0 %vm4934_vm0, %v4935_v1  ;;  %4438 = vmatpush3.bf16.msra.mxu0 %v5026_v59 }
 0x2df   :  { %4439 = vmatprep.subr.bf16.mxu0 %v4933_v0 }
 0x2e2   :  { %4441 = vmatpush3.bf16.msra.mxu0 %v5031_v4 }
 0x2e3   :  { %4448 = vmatprep.subr.bf16.mxu0 %v4933_v0 }
 0x3b0   :  { %v325_v43 = vpop.f32.mrb[2].mxu0 }
 0x3b1   :  { %v326_v44 = vadd.f32 %v5018_v42, %v325_v43  ;;  %v4006_v45 = vpop.f32.mrb[3].mxu0  ;;  %v679_v43 = vrot.slane %v5002_v31, 6 }
 0x3b3   :  { %4712 = vtanh.f32 %v326_v44  ;;  %v3713_v47 = vmul.f32 -1.442695, %v326_v44 }
 0x3b5   :  { %4714 = vpow2.f32 %v3713_v47 }
 0x3bd   :  { %v4713_v46 = vpop.eup %4712 }
 0x3be   :  { %338 = vrot.lane.b32.xlu0 %v4713_v46, %s4936_s0 }
 0x3bf   :  { %v4715_v48 = vpop.eup %4714 }
 0x3c0   :  { %v332_v49 = vadd.f32 1.0, %v4715_v48  ;;  %v47_v48 = vld [vmem:[#allocation2 + $0x98] sm:$0xff] }
 0x3c2   :  { %4716 = vrcp.f32 %v332_v49  ;;  %v48_v49 = vld [vmem:[#allocation2 + $0xa0] sm:$0xff] }
 0x3cc   :  { %v4717_v50 = vpop.eup %4716 }
 0x3cd   :  { %v336_v53 = vmul.f32 0.0, %v4717_v50 }
 0x430   :  { %v339_v51 = vpop.permute.xlu0 %338 }
 0x431   :  { %v341_v52 = vmul.f32 %v4717_v50, %v339_v51  ;;  %v5077_v51 = vpack.c.bf16 %v48_v49, %v47_v48 }
 0x433   :  { %343 = vrot.lane.b32.xlu1 %v341_v52, %s4937_s29  ;;  %v50_v52 = vld [vmem:[#allocation2 + $0xb0] sm:$0xff] }
 0x4a5   :  { %v344_v54 = vpop.permute.xlu1 %343 }
 0x4a6   :  { %v5023_v55 = vadd.f32 %v344_v54, %v336_v53 }
 0x4a8   :  { %4718 = vtanh.f32 %v5023_v55 }
 0x4b2   :  { %v4719_v6 = vpop.eup %4718 }
 0x4b3   :  { %349 = vrot.lane.b32.xlu0 %v4719_v6, %s4936_s0 }
 0x525   :  { %v350_v7 = vpop.permute.xlu0 %349 }
 0x526   :  { %v352_v9 = vmul.f32 %v4717_v50, %v350_v7  ;;  %v49_v50 = vld [vmem:[#allocation2 + $0xa8] sm:$0xff] }
 0x527   :  { %v5080_v53 = vpack.c.bf16 %v50_v52, %v49_v50 }
 0x528   :  { %354 = vrot.lane.b32.xlu1 %v352_v9, %s4937_s29 }
 0x59a   :  { %v355_v10 = vpop.permute.xlu1 %354 }
 0x59b   :  { %4016 = vmatmul.mubr.msk.f32.vlgmr.msra.gmra.mrb[2].mxu1 %vm155_vm2, %v355_v10  ;;  %4027 = vmatmul.mubr.msk.f32.vlgmr.msra.gmra.mrb[4].mxu0 %vm155_vm2, %v355_v10 }
 0x59c   :  { %4450 = vmatpush3.bf16.msra.mxu0 %v4976_v8  ;;  %4048 = vmatprep.mubr.msk.f32.mxu0 %vm4934_vm0, %v4935_v1 }
 0x59d   :  { %4451 = vmatprep.subr.bf16.mxu0 %v4933_v0  ;;  %4037 = vmatprep.mubr.msk.f32.mxu1 %vm4934_vm0, %v4935_v1 }
 0x59e   :  { %4444 = vmatpush3.bf16.msra.mxu1 %v5077_v51 }
 0x59f   :  { %4445 = vmatprep.subr.bf16.mxu1 %v4933_v0 }
 0x5a0   :  { %4453 = vmatpush3.bf16.msra.mxu0 %v4980_v12 }
 0x5a1   :  { %4460 = vmatprep.subr.bf16.mxu0 %v4933_v0 }
 0x5a2   :  { %4447 = vmatpush3.bf16.msra.mxu1 %v5080_v53 }
 0x5a3   :  { %4049 = vmatmul.mubr.msk.f32.vlgmr.msra.gmra.mrb[6].mxu0 %vm155_vm2, %v256_v41  ;;  %4454 = vmatprep.subr.bf16.mxu1 %v4933_v0 }
 0x5a4   :  { %4462 = vmatpush3.bf16.msra.mxu0 %v5028_v63  ;;  %4070 = vmatprep.mubr.msk.f32.mxu0 %vm4934_vm0, %v4935_v1 }
 0x5a5   :  { %4463 = vmatprep.subr.bf16.mxu0 %v4933_v0 }
 0x5a8   :  { %4465 = vmatpush3.bf16.msra.mxu0 %v5035_v5 }
 0x5a9   :  { %4472 = vmatprep.subr.bf16.mxu0 %v4933_v0 }
 0x66e   :  { %v494_v13 = vpop.f32.mrb[4].mxu0 }
 0x66f   :  { %v495_v14 = vadd.f32 %v5061_v11, %v494_v13  ;;  %v4028_v15 = vpop.f32.mrb[5].mxu0 }
 0x671   :  { %4720 = vtanh.f32 %v495_v14  ;;  %v3716_v24 = vmul.f32 -1.442695, %v495_v14 }
 0x676   :  { %v663_v17 = vpop.f32.mrb[6].mxu0 }
 0x677   :  { %v668_v19 = vrot.slane %v663_v17, 6  ;;  %v4050_v20 = vpop.f32.mrb[7].mxu0 }
 0x679   :  { %v670_v21 = vadd.f32 %v668_v19, %v4997_v18 }
 0x67b   :  { %v4721_v22 = vpop.eup %4720  ;;  %4722 = vtanh.f32 %v670_v21  ;;  %v3719_v25 = vmul.f32 -1.442695, %v670_v21 }
 0x67c   :  { %507 = vrot.lane.b32.xlu0 %v4721_v22, %s4936_s0  ;;  %4724 = vpow2.f32 %v3716_v24 }
 0x67d   :  { %4726 = vpow2.f32 %v3719_v25 }
 0x685   :  { %v4723_v23 = vpop.eup %4722 }
 0x686   :  { %683 = vrot.lane.b32.xlu1 %v4723_v23, %s4936_s0  ;;  %v4725_v26 = vpop.eup %4724 }
 0x687   :  { %v501_v27 = vadd.f32 1.0, %v4725_v26  ;;  %v4727_v28 = vpop.eup %4726 }
 0x688   :  { %v674_v29 = vadd.f32 1.0, %v4727_v28 }
 0x689   :  { %4728 = vrcp.f32 %v501_v27 }
 0x68a   :  { %4730 = vrcp.f32 %v674_v29 }
 0x693   :  { %v4729_v30 = vpop.eup %4728 }
 0x694   :  { %v4731_v34 = vpop.eup %4730  ;;  %v505_v39 = vmul.f32 0.0, %v4729_v30 }
 0x695   :  { %v681_v44 = vmul.f32 %v4731_v34, %v679_v43 }
 0x6ee   :  { %v508_v32 = vpop.permute.xlu0 %507 }
 0x6ef   :  { %v510_v33 = vmul.f32 %v4729_v30, %v508_v32 }
 0x6f1   :  { %512 = vrot.lane.b32.xlu0 %v510_v33, %s4937_s29 }
 0x6f8   :  { %v684_v36 = vpop.permute.xlu1 %683 }
 0x6f9   :  { %v686_v38 = vmul.f32 %v4731_v34, %v684_v36 }
 0x6fb   :  { %688 = vrot.lane.b32.xlu1 %v686_v38, %s4937_s29 }
 0x763   :  { %v513_v40 = vpop.permute.xlu0 %512 }
 0x764   :  { %v5069_v41 = vadd.f32 %v513_v40, %v505_v39 }
 0x766   :  { %4732 = vtanh.f32 %v5069_v41 }
 0x76d   :  { %v689_v45 = vpop.permute.xlu1 %688 }
 0x76e   :  { %v5073_v46 = vadd.f32 %v689_v45, %v681_v44 }
 0x770   :  { %v4733_v47 = vpop.eup %4732  ;;  %4734 = vtanh.f32 %v5073_v46 }
 0x771   :  { %518 = vrot.lane.b32.xlu0 %v4733_v47, %s4936_s0 }
 0x77a   :  { %v4735_v31 = vpop.eup %4734 }
 0x77b   :  { %694 = vrot.lane.b32.xlu1 %v4735_v31, %s4936_s0 }
 0x7e3   :  { %v519_v54 = vpop.permute.xlu0 %518 }
 0x7e4   :  { %v5086_v56 = vmul.f32 %v4729_v30, %v519_v54 }
 0x7e6   :  { %523 = vrot.lane.b32.xlu0 %v5086_v56, %s4937_s29 }
 0x7ed   :  { %v695_v57 = vpop.permute.xlu1 %694 }
 0x7ee   :  { %v697_v58 = vmul.f32 %v4731_v34, %v695_v57 }
 0x7f0   :  { %v699_v60 = vrot.slane %v697_v58, 2  ;;  %v1124_v58 = vrot.slane %v5073_v46, 6 }
 0x7f2   :  { %700 = vrot.lane.b32.xlu1 %v699_v60, %s4937_s29 }
 0x858   :  { %v524_v61 = vpop.permute.xlu0 %523 }
 0x859   :  { %4038 = vmatmul.mubr.msk.f32.vlgmr.msra.gmra.mrb[4].mxu1 %vm155_vm2, %v524_v61 }
 0x85a   :  { %4456 = vmatpush3.bf16.msra.mxu1 %v5005_v35  ;;  %4059 = vmatprep.mubr.msk.f32.mxu1 %vm4934_vm0, %v4935_v1 }
 0x85b   :  { %4457 = vmatprep.subr.bf16.mxu1 %v4933_v0 }
 0x85e   :  { %4459 = vmatpush3.bf16.msra.mxu1 %v5008_v37 }
 0x85f   :  { %4466 = vmatprep.subr.bf16.mxu1 %v4933_v0 }
 0x864   :  { %v701_v62 = vpop.permute.xlu1 %700 }
 0x865   :  { %4060 = vmatmul.mubr.msk.f32.vlgmr.msra.gmra.mrb[2].mxu1 %vm155_vm2, %v701_v62 }
 0x866   :  { %4468 = vmatpush3.bf16.msra.mxu1 %v5026_v59  ;;  %4081 = vmatprep.mubr.msk.f32.mxu1 %vm4934_vm0, %v4935_v1 }
 0x867   :  { %4469 = vmatprep.subr.bf16.mxu1 %v4933_v0 }
 0x86a   :  { %4471 = vmatpush3.bf16.msra.mxu1 %v5031_v4 }
 0x86b   :  { %4478 = vmatprep.subr.bf16.mxu1 %v4933_v0 }
 0x938   :  { %v770_v2 = vpop.f32.mrb[2].mxu1 }
 0x939   :  { %v4654_v3 = vadd.f32 %v5018_v42, %v770_v2  ;;  %v4061_v6 = vpop.f32.mrb[3].mxu1 }
 0x93b   :  { %4736 = vtanh.f32 %v4654_v3  ;;  %v3721_v9 = vmul.f32 -1.442695, %v4654_v3 }
 0x93d   :  { %4738 = vpow2.f32 %v3721_v9 }
 0x945   :  { %v4737_v7 = vpop.eup %4736 }
 0x946   :  { %783 = vrot.lane.b32.xlu0 %v4737_v7, %s4936_s0 }
 0x947   :  { %v4739_v10 = vpop.eup %4738 }
 0x948   :  { %v777_v13 = vadd.f32 1.0, %v4739_v10 }
 0x94a   :  { %4740 = vrcp.f32 %v777_v13 }
 0x954   :  { %v4741_v14 = vpop.eup %4740 }
 0x955   :  { %v781_v19 = vmul.f32 %v4741_v14, %v5023_v55 }
 0x9b8   :  { %v784_v15 = vpop.permute.xlu0 %783 }
 0x9b9   :  { %v786_v17 = vmul.f32 %v4741_v14, %v784_v15 }
 0x9bb   :  { %788 = vrot.lane.b32.xlu1 %v786_v17, %s4937_s29 }
 0xa2d   :  { %v789_v20 = vpop.permute.xlu1 %788 }
 0xa2e   :  { %v5109_v21 = vadd.f32 %v789_v20, %v781_v19 }
 0xa30   :  { %4742 = vtanh.f32 %v5109_v21 }
 0xa3a   :  { %v4743_v22 = vpop.eup %4742 }
 0xa3b   :  { %794 = vrot.lane.b32.xlu0 %v4743_v22, %s4936_s0 }
 0xaad   :  { %v795_v23 = vpop.permute.xlu0 %794 }
 0xaae   :  { %v797_v24 = vmul.f32 %v4741_v14, %v795_v23 }
 0xab0   :  { %799 = vrot.lane.b32.xlu1 %v797_v24, %s4937_s29 }
 0xb22   :  { %v800_v25 = vpop.permute.xlu1 %799 }
 0xb23   :  { %4071 = vmatmul.mubr.msk.f32.vlgmr.msra.gmra.mrb[8].mxu0 %vm155_vm2, %v800_v25  ;;  %4082 = vmatmul.mubr.msk.f32.vlgmr.msra.gmra.mrb[4].mxu1 %vm155_vm2, %v800_v25 }
 0xb24   :  { %4480 = vmatpush3.bf16.msra.mxu1 %v4976_v8  ;;  %4103 = vmatprep.mubr.msk.f32.mxu1 %vm4934_vm0, %v4935_v1 }
 0xb25   :  { %4481 = vmatprep.subr.bf16.mxu1 %v4933_v0  ;;  %4474 = vmatpush3.bf16.msra.mxu0 %v5077_v51 }
 0xb26   :  { %4475 = vmatprep.subr.bf16.mxu0 %v4933_v0  ;;  %4092 = vmatprep.mubr.msk.f32.mxu0 %vm4934_vm0, %v4935_v1 }
 0xb28   :  { %4483 = vmatpush3.bf16.msra.mxu1 %v4980_v12 }
 0xb29   :  { %4477 = vmatpush3.bf16.msra.mxu0 %v5080_v53  ;;  %4490 = vmatprep.subr.bf16.mxu1 %v4933_v0 }
 0xb2a   :  { %4484 = vmatprep.subr.bf16.mxu0 %v4933_v0 }
 0xb2b   :  { %4104 = vmatmul.mubr.msk.f32.vlgmr.msra.gmra.mrb[6].mxu1 %vm155_vm2, %v701_v62 }
 0xb2c   :  { %4492 = vmatpush3.bf16.msra.mxu1 %v5028_v63  ;;  %4125 = vmatprep.mubr.msk.f32.mxu1 %vm4934_vm0, %v4935_v1 }
 0xb2d   :  { %4493 = vmatprep.subr.bf16.mxu1 %v4933_v0 }
 0xb30   :  { %4495 = vmatpush3.bf16.msra.mxu1 %v5035_v5 }
 0xb31   :  { %4502 = vmatprep.subr.bf16.mxu1 %v4933_v0 }
 0xbf6   :  { %v939_v55 = vpop.f32.mrb[4].mxu1 }
 0xbf7   :  { %v4655_v26 = vadd.f32 %v5061_v11, %v939_v55  ;;  %v4083_v27 = vpop.f32.mrb[5].mxu1 }
 0xbf9   :  { %4744 = vtanh.f32 %v4655_v26  ;;  %v3724_v36 = vmul.f32 -1.442695, %v4655_v26 }
 0xbfe   :  { %v1108_v28 = vpop.f32.mrb[6].mxu1 }
 0xbff   :  { %v1113_v29 = vrot.slane %v1108_v28, 4  ;;  %v4105_v30 = vpop.f32.mrb[7].mxu1 }
 0xc01   :  { %v1115_v32 = vadd.f32 %v1113_v29, %v4997_v18 }
 0xc03   :  { %v4745_v33 = vpop.eup %4744  ;;  %4746 = vtanh.f32 %v1115_v32  ;;  %v3727_v38 = vmul.f32 -1.442695, %v1115_v32 }
 0xc04   :  { %952 = vrot.lane.b32.xlu0 %v4745_v33, %s4936_s0  ;;  %4748 = vpow2.f32 %v3724_v36 }
 0xc05   :  { %4750 = vpow2.f32 %v3727_v38 }
 0xc0d   :  { %v4747_v34 = vpop.eup %4746 }
 0xc0e   :  { %1128 = vrot.lane.b32.xlu1 %v4747_v34, %s4936_s0  ;;  %v4749_v39 = vpop.eup %4748 }
 0xc0f   :  { %v946_v40 = vadd.f32 1.0, %v4749_v39  ;;  %v4751_v43 = vpop.eup %4750 }
 0xc10   :  { %v1119_v44 = vadd.f32 1.0, %v4751_v43 }
 0xc11   :  { %4752 = vrcp.f32 %v946_v40 }
 0xc12   :  { %4754 = vrcp.f32 %v1119_v44 }
 0xc1b   :  { %v4753_v45 = vpop.eup %4752 }
 0xc1c   :  { %v4755_v49 = vpop.eup %4754  ;;  %v950_v31 = vmul.f32 %v4753_v45, %v5069_v41 }
 0xc1d   :  { %v1126_v60 = vmul.f32 %v4755_v49, %v1124_v58 }
 0xc76   :  { %v953_v47 = vpop.permute.xlu0 %952 }
 0xc77   :  { %v955_v48 = vmul.f32 %v4753_v45, %v953_v47 }
 0xc79   :  { %957 = vrot.lane.b32.xlu0 %v955_v48, %s4937_s29 }
 0xc80   :  { %v1129_v50 = vpop.permute.xlu1 %1128 }
 0xc81   :  { %v1131_v52 = vmul.f32 %v4755_v49, %v1129_v50 }
 0xc83   :  { %1133 = vrot.lane.b32.xlu1 %v1131_v52, %s4937_s29 }
 0xceb   :  { %v958_v54 = vpop.permute.xlu0 %957 }
 0xcec   :  { %v5142_v57 = vadd.f32 %v958_v54, %v950_v31 }
 0xcee   :  { %4756 = vtanh.f32 %v5142_v57 }
 0xcf5   :  { %v1134_v61 = vpop.permute.xlu1 %1133 }
 0xcf6   :  { %v5146_v62 = vadd.f32 %v1134_v61, %v1126_v60 }
 0xcf8   :  { %v4757_v2 = vpop.eup %4756  ;;  %4758 = vtanh.f32 %v5146_v62 }
 0xcf9   :  { %963 = vrot.lane.b32.xlu0 %v4757_v2, %s4936_s0 }
 0xd02   :  { %v4759_v3 = vpop.eup %4758 }
 0xd03   :  { %1139 = vrot.lane.b32.xlu1 %v4759_v3, %s4936_s0 }
 0xd6b   :  { %v964_v41 = vpop.permute.xlu0 %963 }
 0xd6c   :  { %v5151_v6 = vmul.f32 %v4753_v45, %v964_v41 }
 0xd6e   :  { %968 = vrot.lane.b32.xlu0 %v5151_v6, %s4937_s29 }
 0xd75   :  { %v1140_v7 = vpop.permute.xlu1 %1139 }
 0xd76   :  { %v1142_v46 = vmul.f32 %v4755_v49, %v1140_v7 }
 0xd78   :  { %v1144_v9 = vrot.slane %v1142_v46, 4  ;;  %v1569_v46 = vrot.slane %v5146_v62, 6 }
 0xd7a   :  { %1145 = vrot.lane.b32.xlu1 %v1144_v9, %s4937_s29 }
 0xde0   :  { %v969_v10 = vpop.permute.xlu0 %968 }
 0xde1   :  { %4093 = vmatmul.mubr.msk.f32.vlgmr.msra.gmra.mrb[10].mxu0 %vm155_vm2, %v969_v10 }
 0xde2   :  { %4486 = vmatpush3.bf16.msra.mxu0 %v5005_v35  ;;  %4114 = vmatprep.mubr.msk.f32.mxu0 %vm4934_vm0, %v4935_v1 }
 0xde3   :  { %4487 = vmatprep.subr.bf16.mxu0 %v4933_v0 }
 0xde6   :  { %4489 = vmatpush3.bf16.msra.mxu0 %v5008_v37 }
 0xde7   :  { %4496 = vmatprep.subr.bf16.mxu0 %v4933_v0 }
 0xdec   :  { %v1146_v13 = vpop.permute.xlu1 %1145 }
 0xded   :  { %4115 = vmatmul.mubr.msk.f32.vlgmr.msra.gmra.mrb[8].mxu0 %vm155_vm2, %v1146_v13 }
 0xdee   :  { %4498 = vmatpush3.bf16.msra.mxu0 %v5026_v59  ;;  %4136 = vmatprep.mubr.msk.f32.mxu0 %vm4934_vm0, %v4935_v1 }
 0xdef   :  { %4499 = vmatprep.subr.bf16.mxu0 %v4933_v0 }
 0xdf2   :  { %4501 = vmatpush3.bf16.msra.mxu0 %v5031_v4 }
 0xdf3   :  { %4508 = vmatprep.subr.bf16.mxu0 %v4933_v0 }
 0xec0   :  { %v1215_v14 = vpop.f32.mrb[8].mxu0 }
 0xec1   :  { %v4656_v15 = vadd.f32 %v5018_v42, %v1215_v14  ;;  %v4116_v17 = vpop.f32.mrb[9].mxu0 }
 0xec3   :  { %4760 = vtanh.f32 %v4656_v15  ;;  %v3729_v20 = vmul.f32 -1.442695, %v4656_v15 }
 0xec5   :  { %4762 = vpow2.f32 %v3729_v20 }
 0xecd   :  { %v4761_v19 = vpop.eup %4760 }
 0xece   :  { %1228 = vrot.lane.b32.xlu0 %v4761_v19, %s4936_s0 }
 0xecf   :  { %v4763_v22 = vpop.eup %4762 }
 0xed0   :  { %v1222_v23 = vadd.f32 1.0, %v4763_v22 }
 0xed2   :  { %4764 = vrcp.f32 %v1222_v23 }
 0xedc   :  { %v4765_v24 = vpop.eup %4764 }
 0xedd   :  { %v1226_v26 = vmul.f32 %v4765_v24, %v5109_v21 }
 0xf40   :  { %v1229_v25 = vpop.permute.xlu0 %1228 }
 0xf41   :  { %v1231_v55 = vmul.f32 %v4765_v24, %v1229_v25 }
 0xf43   :  { %1233 = vrot.lane.b32.xlu1 %v1231_v55, %s4937_s29 }
 0xfb5   :  { %v1234_v27 = vpop.permute.xlu1 %1233 }
 0xfb6   :  { %v5174_v28 = vadd.f32 %v1234_v27, %v1226_v26 }
 0xfb8   :  { %4766 = vtanh.f32 %v5174_v28 }
 0xfc2   :  { %v4767_v29 = vpop.eup %4766 }
 0xfc3   :  { %1239 = vrot.lane.b32.xlu0 %v4767_v29, %s4936_s0 }
0x1035   :  { %v1240_v30 = vpop.permute.xlu0 %1239 }
0x1036   :  { %v1242_v32 = vmul.f32 %v4765_v24, %v1240_v30 }
0x1038   :  { %1244 = vrot.lane.b32.xlu1 %v1242_v32, %s4937_s29 }
0x10aa   :  { %v1245_v33 = vpop.permute.xlu1 %1244 }
0x10ab   :  { %4126 = vmatmul.mubr.msk.f32.vlgmr.msra.gmra.mrb[8].mxu1 %vm155_vm2, %v1245_v33  ;;  %4137 = vmatmul.mubr.msk.f32.vlgmr.msra.gmra.mrb[10].mxu0 %vm155_vm2, %v1245_v33 }
0x10ac   :  { %4510 = vmatpush3.bf16.msra.mxu0 %v4976_v8  ;;  %4158 = vmatprep.mubr.msk.f32.mxu0 %vm4934_vm0, %v4935_v1 }
0x10ad   :  { %4511 = vmatprep.subr.bf16.mxu0 %v4933_v0  ;;  %4504 = vmatpush3.bf16.msra.mxu1 %v5077_v51 }
0x10ae   :  { %4505 = vmatprep.subr.bf16.mxu1 %v4933_v0  ;;  %4147 = vmatprep.mubr.msk.f32.mxu1 %vm4934_vm0, %v4935_v1 }
0x10b0   :  { %4513 = vmatpush3.bf16.msra.mxu0 %v4980_v12 }
0x10b1   :  { %4507 = vmatpush3.bf16.msra.mxu1 %v5080_v53  ;;  %4520 = vmatprep.subr.bf16.mxu0 %v4933_v0 }
0x10b2   :  { %4514 = vmatprep.subr.bf16.mxu1 %v4933_v0 }
0x10b3   :  { %4159 = vmatmul.mubr.msk.f32.vlgmr.msra.gmra.mrb[12].mxu0 %vm155_vm2, %v1146_v13 }
0x10b4   :  { %4522 = vmatpush3.bf16.msra.mxu0 %v5028_v63  ;;  %4180 = vmatprep.mubr.msk.f32.mxu0 %vm4934_vm0, %v4935_v1 }
0x10b5   :  { %4523 = vmatprep.subr.bf16.mxu0 %v4933_v0 }
0x10b8   :  { %4525 = vmatpush3.bf16.msra.mxu0 %v5035_v5 }
0x10b9   :  { %4532 = vmatprep.subr.bf16.mxu0 %v4933_v0 }
0x117e   :  { %v1384_v21 = vpop.f32.mrb[10].mxu0 }
0x117f   :  { %v4657_v34 = vadd.f32 %v5061_v11, %v1384_v21  ;;  %v4138_v36 = vpop.f32.mrb[11].mxu0 }
0x1181   :  { %4768 = vtanh.f32 %v4657_v34  ;;  %v3732_v47 = vmul.f32 -1.442695, %v4657_v34 }
0x1186   :  { %v1553_v38 = vpop.f32.mrb[12].mxu0 }
0x1187   :  { %v1558_v39 = vrot.slane %v1553_v38, 2  ;;  %v4160_v40 = vpop.f32.mrb[13].mxu0 }
0x1189   :  { %v1560_v43 = vadd.f32 %v1558_v39, %v4997_v18 }
0x118b   :  { %v4769_v44 = vpop.eup %4768  ;;  %4770 = vtanh.f32 %v1560_v43  ;;  %v3735_v48 = vmul.f32 -1.442695, %v1560_v43 }
0x118c   :  { %1397 = vrot.lane.b32.xlu0 %v4769_v44, %s4936_s0  ;;  %4772 = vpow2.f32 %v3732_v47 }
0x118d   :  { %4774 = vpow2.f32 %v3735_v48 }
0x1195   :  { %v4771_v45 = vpop.eup %4770 }
0x1196   :  { %1573 = vrot.lane.b32.xlu1 %v4771_v45, %s4936_s0  ;;  %v4773_v49 = vpop.eup %4772 }
0x1197   :  { %v1391_v50 = vadd.f32 1.0, %v4773_v49  ;;  %v4775_v52 = vpop.eup %4774 }
0x1198   :  { %v1564_v31 = vadd.f32 1.0, %v4775_v52 }
0x1199   :  { %4776 = vrcp.f32 %v1391_v50 }
0x119a   :  { %4778 = vrcp.f32 %v1564_v31 }
0x11a3   :  { %v4777_v54 = vpop.eup %4776 }
0x11a4   :  { %v4779_v60 = vpop.eup %4778  ;;  %v1395_v3 = vmul.f32 %v4777_v54, %v5142_v57  ;;  %v3563_v57 = vrot.slane %v5151_v6, 6 }
0x11a5   :  { %v1571_v9 = vmul.f32 %v4779_v60, %v1569_v46 }
0x11a6   :  { %v3577_v62 = vsel %vm3576_vm3, %v5086_v56, %v3563_v57 }
0x11fe   :  { %v1398_v58 = vpop.permute.xlu0 %1397 }
0x11ff   :  { %v1400_v18 = vmul.f32 %v4777_v54, %v1398_v58 }
0x1201   :  { %1402 = vrot.lane.b32.xlu0 %v1400_v18, %s4937_s29 }
0x1208   :  { %v1574_v61 = vpop.permute.xlu1 %1573 }
0x1209   :  { %v1576_v2 = vmul.f32 %v4779_v60, %v1574_v61 }
0x120b   :  { %1578 = vrot.lane.b32.xlu1 %v1576_v2, %s4937_s29 }
0x1273   :  { %v1403_v41 = vpop.permute.xlu0 %1402 }
0x1274   :  { %v5207_v7 = vadd.f32 %v1403_v41, %v1395_v3 }
0x1276   :  { %4780 = vtanh.f32 %v5207_v7 }
0x127d   :  { %v1579_v10 = vpop.permute.xlu1 %1578 }
0x127e   :  { %v5211_v13 = vadd.f32 %v1579_v10, %v1571_v9 }
0x1280   :  { %v4781_v14 = vpop.eup %4780  ;;  %4782 = vtanh.f32 %v5211_v13 }
0x1281   :  { %1408 = vrot.lane.b32.xlu0 %v4781_v14, %s4936_s0 }
0x128a   :  { %v4783_v15 = vpop.eup %4782 }
0x128b   :  { %1584 = vrot.lane.b32.xlu1 %v4783_v15, %s4936_s0 }
0x12f3   :  { %v1409_v17 = vpop.permute.xlu0 %1408 }
0x12f4   :  { %v1411_v19 = vmul.f32 %v4777_v54, %v1409_v17 }
0x12f6   :  { %v3565_v20 = vrot.slane %v1411_v19, 4  ;;  %1413 = vrot.lane.b32.xlu0 %v1411_v19, %s4937_s29 }
0x12f8   :  { %v5221_v22 = vsel %vm3578_vm4, %v3577_v62, %v3565_v20  ;;  %v2011_v62 = vrot.slane %v5211_v13, 6 }
0x12fd   :  { %v1585_v23 = vpop.permute.xlu1 %1584 }
0x12fe   :  { %v1587_v24 = vmul.f32 %v4779_v60, %v1585_v23 }
0x1300   :  { %v1589_v25 = vrot.slane %v1587_v24, 6 }
0x1302   :  { %1590 = vrot.lane.b32.xlu1 %v1589_v25, %s4937_s29 }
0x1368   :  { %v1414_v55 = vpop.permute.xlu0 %1413 }
0x1369   :  { %4148 = vmatmul.mubr.msk.f32.vlgmr.msra.gmra.mrb[10].mxu1 %vm155_vm2, %v1414_v55 }
0x136a   :  { %4516 = vmatpush3.bf16.msra.mxu1 %v5005_v35  ;;  %4169 = vmatprep.mubr.msk.f32.mxu1 %vm4934_vm0, %v4935_v1 }
0x136b   :  { %4517 = vmatprep.subr.bf16.mxu1 %v4933_v0 }
0x136e   :  { %4519 = vmatpush3.bf16.msra.mxu1 %v5008_v37 }
0x136f   :  { %4526 = vmatprep.subr.bf16.mxu1 %v4933_v0 }
0x1374   :  { %v1591_v56 = vpop.permute.xlu1 %1590 }
0x1375   :  { %4170 = vmatmul.mubr.msk.f32.vlgmr.msra.gmra.mrb[8].mxu1 %vm155_vm2, %v1591_v56 }
0x1376   :  { %4528 = vmatpush3.bf16.msra.mxu1 %v5026_v59  ;;  %4191 = vmatprep.mubr.msk.f32.mxu1 %vm4934_vm0, %v4935_v1 }
0x1377   :  { %4529 = vmatprep.subr.bf16.mxu1 %v4933_v0 }
0x137a   :  { %4531 = vmatpush3.bf16.msra.mxu1 %v5031_v4 }
0x137b   :  { %4538 = vmatprep.subr.bf16.mxu1 %v4933_v0 }
0x1448   :  { %v1660_v6 = vpop.f32.mrb[8].mxu1 }
0x1449   :  { %v4658_v26 = vadd.f32 %v5018_v42, %v1660_v6  ;;  %v4171_v27 = vpop.f32.mrb[9].mxu1 }
0x144b   :  { %4784 = vtanh.f32 %v4658_v26  ;;  %v3737_v30 = vmul.f32 -1.442695, %v4658_v26 }
0x144d   :  { %4786 = vpow2.f32 %v3737_v30 }
0x1455   :  { %v4785_v29 = vpop.eup %4784 }
0x1456   :  { %1673 = vrot.lane.b32.xlu0 %v4785_v29, %s4936_s0 }
0x1457   :  { %v4787_v32 = vpop.eup %4786 }
0x1458   :  { %v1667_v33 = vadd.f32 1.0, %v4787_v32 }
0x145a   :  { %4788 = vrcp.f32 %v1667_v33 }
0x1464   :  { %v4789_v21 = vpop.eup %4788 }
0x1465   :  { %v1671_v38 = vmul.f32 %v4789_v21, %v5174_v28 }
0x14c8   :  { %v1674_v34 = vpop.permute.xlu0 %1673 }
0x14c9   :  { %v1676_v36 = vmul.f32 %v4789_v21, %v1674_v34 }
0x14cb   :  { %1678 = vrot.lane.b32.xlu1 %v1676_v36, %s4937_s29 }
0x153d   :  { %v1679_v39 = vpop.permute.xlu1 %1678 }
0x153e   :  { %v5242_v40 = vadd.f32 %v1679_v39, %v1671_v38 }
0x1540   :  { %4790 = vtanh.f32 %v5242_v40 }
0x154a   :  { %v4791_v43 = vpop.eup %4790 }
0x154b   :  { %1684 = vrot.lane.b32.xlu0 %v4791_v43, %s4936_s0 }
0x15bd   :  { %v1685_v44 = vpop.permute.xlu0 %1684 }
0x15be   :  { %v1687_v45 = vmul.f32 %v4789_v21, %v1685_v44 }
0x15c0   :  { %1689 = vrot.lane.b32.xlu1 %v1687_v45, %s4937_s29 }
0x1632   :  { %v1690_v47 = vpop.permute.xlu1 %1689 }
0x1633   :  { %4181 = vmatmul.mubr.msk.f32.vlgmr.msra.gmra.mrb[14].mxu0 %vm155_vm2, %v1690_v47  ;;  %4192 = vmatmul.mubr.msk.f32.vlgmr.msra.gmra.mrb[10].mxu1 %vm155_vm2, %v1690_v47 }
0x1634   :  { %4540 = vmatpush3.bf16.msra.mxu1 %v4976_v8  ;;  %4213 = vmatprep.mubr.msk.f32.mxu1 %vm4934_vm0, %v4935_v1 }
0x1635   :  { %4541 = vmatprep.subr.bf16.mxu1 %v4933_v0  ;;  %4534 = vmatpush3.bf16.msra.mxu0 %v5077_v51 }
0x1636   :  { %4535 = vmatprep.subr.bf16.mxu0 %v4933_v0  ;;  %4202 = vmatprep.mubr.msk.f32.mxu0 %vm4934_vm0, %v4935_v1 }
0x1638   :  { %4543 = vmatpush3.bf16.msra.mxu1 %v4980_v12 }
0x1639   :  { %4537 = vmatpush3.bf16.msra.mxu0 %v5080_v53  ;;  %4550 = vmatprep.subr.bf16.mxu1 %v4933_v0 }
0x163a   :  { %4544 = vmatprep.subr.bf16.mxu0 %v4933_v0 }
0x163b   :  { %4214 = vmatmul.mubr.msk.f32.vlgmr.msra.gmra.mrb[12].mxu1 %vm155_vm2, %v1591_v56 }
0x163c   :  { %4552 = vmatpush3.bf16.msra.mxu1 %v5028_v63  ;;  %4235 = vmatprep.mubr.msk.f32.mxu1 %vm4934_vm0, %v4935_v1 }
0x163d   :  { %4553 = vmatprep.subr.bf16.mxu1 %v4933_v0 }
0x1640   :  { %4555 = vmatpush3.bf16.msra.mxu1 %v5035_v5 }
0x1641   :  { %4562 = vmatprep.subr.bf16.mxu1 %v4933_v0 }
0x1706   :  { %v1829_v28 = vpop.f32.mrb[10].mxu1 }
0x1707   :  { %v4659_v48 = vadd.f32 %v5061_v11, %v1829_v28  ;;  %v4193_v49 = vpop.f32.mrb[11].mxu1 }
0x1709   :  { %4792 = vtanh.f32 %v4659_v48  ;;  %v3740_v18 = vmul.f32 -1.442695, %v4659_v48 }
0x170e   :  { %v1998_v50 = vpop.f32.mrb[12].mxu1 }
0x170f   :  { %v2002_v52 = vadd.f32 %v1998_v50, %v4995_v16  ;;  %v4215_v31 = vpop.f32.mrb[13].mxu1 }
0x1711   :  { %4794 = vtanh.f32 %v2002_v52  ;;  %v3743_v60 = vmul.f32 -1.442695, %v2002_v52 }
0x1712   :  { %4796 = vpow2.f32 %v3740_v18 }
0x1713   :  { %v4793_v54 = vpop.eup %4792  ;;  %4798 = vpow2.f32 %v3743_v60 }
0x1714   :  { %1842 = vrot.lane.b32.xlu0 %v4793_v54, %s4936_s0 }
0x171b   :  { %v4795_v58 = vpop.eup %4794 }
0x171c   :  { %2015 = vrot.lane.b32.xlu1 %v4795_v58, %s4936_s0  ;;  %v4797_v61 = vpop.eup %4796 }
0x171d   :  { %v1836_v2 = vadd.f32 1.0, %v4797_v61  ;;  %v4799_v3 = vpop.eup %4798 }
0x171e   :  { %v2006_v41 = vadd.f32 1.0, %v4799_v3 }
0x171f   :  { %4800 = vrcp.f32 %v1836_v2 }
0x1720   :  { %4802 = vrcp.f32 %v2006_v41 }
0x1729   :  { %v4801_v46 = vpop.eup %4800 }
0x172a   :  { %v4803_v14 = vpop.eup %4802  ;;  %v1840_v17 = vmul.f32 %v4801_v46, %v5207_v7 }
0x172b   :  { %v2013_v23 = vmul.f32 %v4803_v14, %v2011_v62 }
0x1786   :  { %v1843_v9 = vpop.permute.xlu0 %1842 }
0x1787   :  { %v1845_v10 = vmul.f32 %v4801_v46, %v1843_v9 }
0x1789   :  { %1847 = vrot.lane.b32.xlu0 %v1845_v10, %s4937_s29 }
0x178e   :  { %v2016_v15 = vpop.permute.xlu1 %2015 }
0x178f   :  { %v2018_v57 = vmul.f32 %v4803_v14, %v2016_v15 }
0x1791   :  { %2020 = vrot.lane.b32.xlu1 %v2018_v57, %s4937_s29 }
0x17fb   :  { %v1848_v19 = vpop.permute.xlu0 %1847 }
0x17fc   :  { %v5275_v20 = vadd.f32 %v1848_v19, %v1840_v17 }
0x17fe   :  { %4804 = vtanh.f32 %v5275_v20 }
0x1803   :  { %v2021_v24 = vpop.permute.xlu1 %2020 }
0x1804   :  { %v5279_v25 = vadd.f32 %v2021_v24, %v2013_v23 }
0x1806   :  { %4806 = vtanh.f32 %v5279_v25 }
0x1808   :  { %v4805_v55 = vpop.eup %4804 }
0x1809   :  { %1853 = vrot.lane.b32.xlu0 %v4805_v55, %s4936_s0 }
0x1810   :  { %v4807_v56 = vpop.eup %4806 }
0x1811   :  { %2026 = vrot.lane.b32.xlu1 %v4807_v56, %s4936_s0 }
0x187b   :  { %v1854_v7 = vpop.permute.xlu0 %1853 }
0x187c   :  { %v1856_v6 = vmul.f32 %v4801_v46, %v1854_v7  ;;  %v2455_v7 = vrot.slane %v5279_v25, 6 }
0x187e   :  { %v3567_v26 = vrot.slane %v1856_v6, 2  ;;  %1858 = vrot.lane.b32.xlu0 %v1856_v6, %s4937_s29 }
0x1880   :  { %v5287_v13 = vsel %vm3580_vm5, %v5221_v22, %v3567_v26 }
0x1883   :  { %v2027_v27 = vpop.permute.xlu1 %2026 }
0x1884   :  { %v2029_v29 = vmul.f32 %v4803_v14, %v2027_v27 }
0x1886   :  { %2031 = vrot.lane.b32.xlu1 %v2029_v29, %s4937_s29 }
0x18f0   :  { %v1859_v30 = vpop.permute.xlu0 %1858 }
0x18f1   :  { %4203 = vmatmul.mubr.msk.f32.vlgmr.msra.gmra.mrb[16].mxu0 %vm155_vm2, %v1859_v30 }
0x18f2   :  { %4546 = vmatpush3.bf16.msra.mxu0 %v5005_v35  ;;  %4224 = vmatprep.mubr.msk.f32.mxu0 %vm4934_vm0, %v4935_v1 }
0x18f3   :  { %4547 = vmatprep.subr.bf16.mxu0 %v4933_v0 }
0x18f6   :  { %4549 = vmatpush3.bf16.msra.mxu0 %v5008_v37 }
0x18f7   :  { %4556 = vmatprep.subr.bf16.mxu0 %v4933_v0 }
0x18f8   :  { %v2032_v22 = vpop.permute.xlu1 %2031 }
0x18f9   :  { %4225 = vmatmul.mubr.msk.f32.vlgmr.msra.gmra.mrb[14].mxu0 %vm155_vm2, %v2032_v22 }
0x18fa   :  { %4558 = vmatpush3.bf16.msra.mxu0 %v5026_v59  ;;  %4246 = vmatprep.mubr.msk.f32.mxu0 %vm4934_vm0, %v4935_v1 }
0x18fb   :  { %4559 = vmatprep.subr.bf16.mxu0 %v4933_v0 }
0x18fe   :  { %4561 = vmatpush3.bf16.msra.mxu0 %v5031_v4 }
0x18ff   :  { %4568 = vmatprep.subr.bf16.mxu0 %v4933_v0 }
0x19cc   :  { %v2101_v32 = vpop.f32.mrb[14].mxu0 }
0x19cd   :  { %v4660_v33 = vadd.f32 %v5018_v42, %v2101_v32  ;;  %v4226_v21 = vpop.f32.mrb[15].mxu0 }
0x19cf   :  { %4808 = vtanh.f32 %v4660_v33  ;;  %v3745_v36 = vmul.f32 -1.442695, %v4660_v33 }
0x19d1   :  { %4810 = vpow2.f32 %v3745_v36 }
0x19d9   :  { %v4809_v34 = vpop.eup %4808 }
0x19da   :  { %2114 = vrot.lane.b32.xlu0 %v4809_v34, %s4936_s0 }
0x19db   :  { %v4811_v38 = vpop.eup %4810 }
0x19dc   :  { %v2108_v39 = vadd.f32 1.0, %v4811_v38  ;;  %v5369_v38 = vld [vmem:[#allocation2 + $0xb9] ss:$0 sm:$0xff] }
0x19de   :  { %4812 = vrcp.f32 %v2108_v39 }
0x19e8   :  { %v4813_v43 = vpop.eup %4812 }
0x19e9   :  { %v2112_v47 = vmul.f32 %v4813_v43, %v5242_v40 }
0x1a4c   :  { %v2115_v44 = vpop.permute.xlu0 %2114 }
0x1a4d   :  { %v2117_v45 = vmul.f32 %v4813_v43, %v2115_v44 }
0x1a4f   :  { %2119 = vrot.lane.b32.xlu1 %v2117_v45, %s4937_s29 }
0x1ac1   :  { %v2120_v28 = vpop.permute.xlu1 %2119 }
0x1ac2   :  { %v5308_v48 = vadd.f32 %v2120_v28, %v2112_v47 }
0x1ac4   :  { %4814 = vtanh.f32 %v5308_v48 }
0x1ace   :  { %v4815_v42 = vpop.eup %4814 }
0x1acf   :  { %2125 = vrot.lane.b32.xlu0 %v4815_v42, %s4936_s0 }
0x1b41   :  { %v2126_v49 = vpop.permute.xlu0 %2125 }
0x1b42   :  { %v2128_v50 = vmul.f32 %v4813_v43, %v2126_v49 }
0x1b44   :  { %2130 = vrot.lane.b32.xlu1 %v2128_v50, %s4937_s29 }
0x1bb6   :  { %v2131_v52 = vpop.permute.xlu1 %2130 }
0x1bb7   :  { %4236 = vmatmul.mubr.msk.f32.vlgmr.msra.gmra.mrb[14].mxu1 %vm155_vm2, %v2131_v52  ;;  %4247 = vmatmul.mubr.msk.f32.vlgmr.msra.gmra.mrb[16].mxu0 %vm155_vm2, %v2131_v52 }
0x1bb8   :  { %4570 = vmatpush3.bf16.msra.mxu0 %v4976_v8  ;;  %4268 = vmatprep.mubr.msk.f32.mxu0 %vm4934_vm0, %v4935_v1 }
0x1bb9   :  { %4571 = vmatprep.subr.bf16.mxu0 %v4933_v0  ;;  %4564 = vmatpush3.bf16.msra.mxu1 %v5077_v51 }
0x1bba   :  { %4565 = vmatprep.subr.bf16.mxu1 %v4933_v0  ;;  %4257 = vmatprep.mubr.msk.f32.mxu1 %vm4934_vm0, %v4935_v1 }
0x1bbc   :  { %4573 = vmatpush3.bf16.msra.mxu0 %v4980_v12 }
0x1bbd   :  { %4567 = vmatpush3.bf16.msra.mxu1 %v5080_v53  ;;  %4580 = vmatprep.subr.bf16.mxu0 %v4933_v0 }
0x1bbe   :  { %4574 = vmatprep.subr.bf16.mxu1 %v4933_v0 }
0x1bbf   :  { %4269 = vmatmul.mubr.msk.f32.vlgmr.msra.gmra.mrb[18].mxu0 %vm155_vm2, %v2032_v22 }
0x1bc0   :  { %4582 = vmatpush3.bf16.msra.mxu0 %v5028_v63  ;;  %4290 = vmatprep.mubr.msk.f32.mxu0 %vm4934_vm0, %v4935_v1 }
0x1bc1   :  { %4583 = vmatprep.subr.bf16.mxu0 %v4933_v0 }
0x1bc4   :  { %4585 = vmatpush3.bf16.msra.mxu0 %v5035_v5 }
0x1bc5   :  { %4592 = vmatprep.subr.bf16.mxu0 %v4933_v0 }
0x1c8a   :  { %v2270_v40 = vpop.f32.mrb[16].mxu0 }
0x1c8b   :  { %v4661_v31 = vadd.f32 %v5061_v11, %v2270_v40  ;;  %v4248_v54 = vpop.f32.mrb[17].mxu0 }
0x1c8d   :  { %4816 = vtanh.f32 %v4661_v31  ;;  %v3748_v41 = vmul.f32 -1.442695, %v4661_v31 }
0x1c92   :  { %v2439_v58 = vpop.f32.mrb[18].mxu0 }
0x1c93   :  { %v2444_v18 = vrot.slane %v2439_v58, 6  ;;  %v4270_v60 = vpop.f32.mrb[19].mxu0 }
0x1c95   :  { %v2446_v61 = vadd.f32 %v2444_v18, %v4995_v16 }
0x1c97   :  { %v4817_v2 = vpop.eup %4816  ;;  %4818 = vtanh.f32 %v2446_v61  ;;  %v3751_v46 = vmul.f32 -1.442695, %v2446_v61  ;;  %v5401_v61 = vld [vmem:[#allocation2 + $0xba] ss:$0 sm:$0xff] }
0x1c98   :  { %2283 = vrot.lane.b32.xlu0 %v4817_v2, %s4936_s0  ;;  %4820 = vpow2.f32 %v3748_v41 }
0x1c99   :  { %4822 = vpow2.f32 %v3751_v46 }
0x1ca1   :  { %v4819_v3 = vpop.eup %4818 }
0x1ca2   :  { %2459 = vrot.lane.b32.xlu1 %v4819_v3, %s4936_s0  ;;  %v4821_v9 = vpop.eup %4820 }
0x1ca3   :  { %v2277_v11 = vadd.f32 1.0, %v4821_v9  ;;  %v4823_v10 = vpop.eup %4822 }
0x1ca4   :  { %v2450_v14 = vadd.f32 1.0, %v4823_v10 }
0x1ca5   :  { %4824 = vrcp.f32 %v2277_v11 }
0x1ca6   :  { %4826 = vrcp.f32 %v2450_v14 }
0x1caf   :  { %v4825_v15 = vpop.eup %4824 }
0x1cb0   :  { %v4827_v19 = vpop.eup %4826  ;;  %v2281_v24 = vmul.f32 %v4825_v15, %v5275_v20 }
0x1cb1   :  { %v2457_v6 = vmul.f32 %v4827_v19, %v2455_v7 }
0x1d0a   :  { %v2284_v57 = vpop.permute.xlu0 %2283 }
0x1d0b   :  { %v2286_v17 = vmul.f32 %v4825_v15, %v2284_v57 }
0x1d0d   :  { %2288 = vrot.lane.b32.xlu0 %v2286_v17, %s4937_s29 }
0x1d14   :  { %v2460_v62 = vpop.permute.xlu1 %2459 }
0x1d15   :  { %v2462_v23 = vmul.f32 %v4827_v19, %v2460_v62 }
0x1d17   :  { %2464 = vrot.lane.b32.xlu1 %v2462_v23, %s4937_s29 }
0x1d7f   :  { %v2289_v55 = vpop.permute.xlu0 %2288 }
0x1d80   :  { %v5341_v56 = vadd.f32 %v2289_v55, %v2281_v24 }
0x1d82   :  { %4828 = vtanh.f32 %v5341_v56 }
0x1d89   :  { %v2465_v26 = vpop.permute.xlu1 %2464 }
0x1d8a   :  { %v5345_v27 = vadd.f32 %v2465_v26, %v2457_v6 }
0x1d8c   :  { %v4829_v29 = vpop.eup %4828  ;;  %4830 = vtanh.f32 %v5345_v27 }
0x1d8d   :  { %2294 = vrot.lane.b32.xlu0 %v4829_v29, %s4936_s0 }
0x1d96   :  { %v4831_v30 = vpop.eup %4830 }
0x1d97   :  { %2470 = vrot.lane.b32.xlu1 %v4831_v30, %s4936_s0 }
0x1dff   :  { %v2295_v20 = vpop.permute.xlu0 %2294 }
0x1e00   :  { %v5350_v22 = vmul.f32 %v4825_v15, %v2295_v20  ;;  %v2900_v20 = vrot.slane %v5345_v27, 6 }
0x1e02   :  { %2299 = vrot.lane.b32.xlu0 %v5350_v22, %s4937_s29 }
0x1e09   :  { %v2471_v32 = vpop.permute.xlu1 %2470 }
0x1e0a   :  { %v2473_v25 = vmul.f32 %v4827_v19, %v2471_v32 }
0x1e0c   :  { %v2475_v33 = vrot.slane %v2473_v25, 2 }
0x1e0e   :  { %2476 = vrot.lane.b32.xlu1 %v2475_v33, %s4937_s29 }
0x1e74   :  { %v2300_v21 = vpop.permute.xlu0 %2299 }
0x1e75   :  { %4258 = vmatmul.mubr.msk.f32.vlgmr.msra.gmra.mrb[16].mxu1 %vm155_vm2, %v2300_v21 }
0x1e76   :  { %4576 = vmatpush3.bf16.msra.mxu1 %v5005_v35  ;;  %4279 = vmatprep.mubr.msk.f32.mxu1 %vm4934_vm0, %v4935_v1 }
0x1e77   :  { %4577 = vmatprep.subr.bf16.mxu1 %v4933_v0 }
0x1e7a   :  { %4579 = vmatpush3.bf16.msra.mxu1 %v5008_v37 }
0x1e7b   :  { %4586 = vmatprep.subr.bf16.mxu1 %v4933_v0 }
0x1e80   :  { %v2477_v34 = vpop.permute.xlu1 %2476 }
0x1e81   :  { %4280 = vmatmul.mubr.msk.f32.vlgmr.msra.gmra.mrb[14].mxu1 %vm155_vm2, %v2477_v34 }
0x1e82   :  { %4588 = vmatpush3.bf16.msra.mxu1 %v5026_v59  ;;  %4301 = vmatprep.mubr.msk.f32.mxu1 %vm4934_vm0, %v4935_v1 }
0x1e83   :  { %4589 = vmatprep.subr.bf16.mxu1 %v4933_v0 }
0x1e86   :  { %4591 = vmatpush3.bf16.msra.mxu1 %v5031_v4 }
0x1e87   :  { %4598 = vmatprep.subr.bf16.mxu1 %v4933_v0 }
0x1f54   :  { %v2546_v36 = vpop.f32.mrb[14].mxu1 }
0x1f55   :  { %v4662_v39 = vadd.f32 %v5369_v38, %v2546_v36  ;;  %v4281_v43 = vpop.f32.mrb[15].mxu1 }
0x1f57   :  { %4832 = vtanh.f32 %v4662_v39  ;;  %v3753_v45 = vmul.f32 -1.442695, %v4662_v39 }
0x1f59   :  { %4834 = vpow2.f32 %v3753_v45 }
0x1f61   :  { %v4833_v44 = vpop.eup %4832 }
0x1f62   :  { %2559 = vrot.lane.b32.xlu0 %v4833_v44, %s4936_s0 }
0x1f63   :  { %v4835_v47 = vpop.eup %4834 }
0x1f64   :  { %v2553_v28 = vadd.f32 1.0, %v4835_v47 }
0x1f66   :  { %4836 = vrcp.f32 %v2553_v28 }
0x1f70   :  { %v4837_v42 = vpop.eup %4836 }
0x1f71   :  { %v2557_v52 = vmul.f32 %v4837_v42, %v5308_v48 }
0x1fd4   :  { %v2560_v49 = vpop.permute.xlu0 %2559 }
0x1fd5   :  { %v2562_v50 = vmul.f32 %v4837_v42, %v2560_v49 }
0x1fd7   :  { %2564 = vrot.lane.b32.xlu1 %v2562_v50, %s4937_s29 }
0x2049   :  { %v2565_v40 = vpop.permute.xlu1 %2564 }
0x204a   :  { %v5375_v31 = vadd.f32 %v2565_v40, %v2557_v52 }
0x204c   :  { %4838 = vtanh.f32 %v5375_v31 }
0x2056   :  { %v4839_v54 = vpop.eup %4838 }
0x2057   :  { %2570 = vrot.lane.b32.xlu0 %v4839_v54, %s4936_s0 }
0x20c9   :  { %v2571_v58 = vpop.permute.xlu0 %2570 }
0x20ca   :  { %v2573_v18 = vmul.f32 %v4837_v42, %v2571_v58 }
0x20cc   :  { %2575 = vrot.lane.b32.xlu1 %v2573_v18, %s4937_s29 }
0x213e   :  { %v2576_v60 = vpop.permute.xlu1 %2575 }
0x213f   :  { %4291 = vmatmul.mubr.msk.f32.vlgmr.msra.gmra.mrb[20].mxu0 %vm155_vm2, %v2576_v60  ;;  %4302 = vmatmul.mubr.msk.f32.vlgmr.msra.gmra.mrb[16].mxu1 %vm155_vm2, %v2576_v60 }
0x2140   :  { %4600 = vmatpush3.bf16.msra.mxu1 %v4976_v8  ;;  %4323 = vmatprep.mubr.msk.f32.mxu1 %vm4934_vm0, %v4935_v1 }
0x2141   :  { %4601 = vmatprep.subr.bf16.mxu1 %v4933_v0  ;;  %4594 = vmatpush3.bf16.msra.mxu0 %v5077_v51 }
0x2142   :  { %4595 = vmatprep.subr.bf16.mxu0 %v4933_v0  ;;  %4312 = vmatprep.mubr.msk.f32.mxu0 %vm4934_vm0, %v4935_v1 }
0x2144   :  { %4603 = vmatpush3.bf16.msra.mxu1 %v4980_v12 }
0x2145   :  { %4597 = vmatpush3.bf16.msra.mxu0 %v5080_v53  ;;  %4610 = vmatprep.subr.bf16.mxu1 %v4933_v0 }
0x2146   :  { %4604 = vmatprep.subr.bf16.mxu0 %v4933_v0 }
0x2147   :  { %4324 = vmatmul.mubr.msk.f32.vlgmr.msra.gmra.mrb[18].mxu1 %vm155_vm2, %v2477_v34 }
0x2148   :  { %4612 = vmatpush3.bf16.msra.mxu1 %v5028_v63  ;;  %4345 = vmatprep.mubr.msk.f32.mxu1 %vm4934_vm0, %v4935_v1 }
0x2149   :  { %4613 = vmatprep.subr.bf16.mxu1 %v4933_v0 }
0x214c   :  { %4615 = vmatpush3.bf16.msra.mxu1 %v5035_v5 }
0x214d   :  { %4622 = vmatprep.subr.bf16.mxu1 %v4933_v0 }
0x2212   :  { %v2715_v48 = vpop.f32.mrb[16].mxu1 }
0x2213   :  { %v4663_v2 = vadd.f32 %v5401_v61, %v2715_v48  ;;  %v4303_v3 = vpop.f32.mrb[17].mxu1 }
0x2215   :  { %4840 = vtanh.f32 %v4663_v2  ;;  %v3756_v5 = vmul.f32 -1.442695, %v4663_v2 }
0x221a   :  { %v2884_v41 = vpop.f32.mrb[18].mxu1 }
0x221b   :  { %v2889_v46 = vrot.slane %v2884_v41, 4  ;;  %v4325_v9 = vpop.f32.mrb[19].mxu1 }
0x221d   :  { %v2891_v63 = vadd.f32 %v2889_v46, %v4995_v16 }
0x221f   :  { %v4841_v11 = vpop.eup %4840  ;;  %4842 = vtanh.f32 %v2891_v63  ;;  %v3759_v14 = vmul.f32 -1.442695, %v2891_v63 }
0x2220   :  { %2728 = vrot.lane.b32.xlu0 %v4841_v11, %s4936_s0  ;;  %4844 = vpow2.f32 %v3756_v5 }
0x2221   :  { %4846 = vpow2.f32 %v3759_v14 }
0x2229   :  { %v4843_v10 = vpop.eup %4842 }
0x222a   :  { %2904 = vrot.lane.b32.xlu1 %v4843_v10, %s4936_s0  ;;  %v4845_v15 = vpop.eup %4844 }
0x222b   :  { %v2722_v57 = vadd.f32 1.0, %v4845_v15  ;;  %v4847_v17 = vpop.eup %4846 }
0x222c   :  { %v2895_v19 = vadd.f32 1.0, %v4847_v17 }
0x222d   :  { %4848 = vrcp.f32 %v2722_v57 }
0x222e   :  { %4850 = vrcp.f32 %v2895_v19 }
0x2237   :  { %v4849_v62 = vpop.eup %4848 }
0x2238   :  { %v4851_v55 = vpop.eup %4850  ;;  %v2726_v26 = vmul.f32 %v4849_v62, %v5341_v56 }
0x2239   :  { %v2902_v32 = vmul.f32 %v4851_v55, %v2900_v20 }
0x2292   :  { %v2729_v23 = vpop.permute.xlu0 %2728 }
0x2293   :  { %v2731_v24 = vmul.f32 %v4849_v62, %v2729_v23 }
0x2295   :  { %2733 = vrot.lane.b32.xlu0 %v2731_v24, %s4937_s29 }
0x229c   :  { %v2905_v7 = vpop.permute.xlu1 %2904 }
0x229d   :  { %v2907_v6 = vmul.f32 %v4851_v55, %v2905_v7 }
0x229f   :  { %2909 = vrot.lane.b32.xlu1 %v2907_v6, %s4937_s29 }
0x2307   :  { %v2734_v29 = vpop.permute.xlu0 %2733 }
0x2308   :  { %v5410_v30 = vadd.f32 %v2734_v29, %v2726_v26 }
0x230a   :  { %4852 = vtanh.f32 %v5410_v30 }
0x2311   :  { %v2910_v25 = vpop.permute.xlu1 %2909 }
0x2312   :  { %v5414_v33 = vadd.f32 %v2910_v25, %v2902_v32 }
0x2314   :  { %v4853_v21 = vpop.eup %4852  ;;  %4854 = vtanh.f32 %v5414_v33  ;;  %v3345_v32 = vrot.slane %v5414_v33, 6 }
0x2315   :  { %2739 = vrot.lane.b32.xlu0 %v4853_v21, %s4936_s0 }
0x231e   :  { %v4855_v34 = vpop.eup %4854 }
0x231f   :  { %2915 = vrot.lane.b32.xlu1 %v4855_v34, %s4936_s0 }
0x2387   :  { %v2740_v56 = vpop.permute.xlu0 %2739 }
0x2388   :  { %v5419_v36 = vmul.f32 %v4849_v62, %v2740_v56 }
0x238a   :  { %2744 = vrot.lane.b32.xlu0 %v5419_v36, %s4937_s29 }
0x2391   :  { %v2916_v39 = vpop.permute.xlu1 %2915 }
0x2392   :  { %v2918_v27 = vmul.f32 %v4851_v55, %v2916_v39 }
0x2394   :  { %v2920_v43 = vrot.slane %v2918_v27, 4  ;;  %v3569_v27 = vrot.slane %v5419_v36, 6 }
0x2396   :  { %2921 = vrot.lane.b32.xlu1 %v2920_v43, %s4937_s29  ;;  %v3582_v33 = vsel %vm3576_vm3, %v5350_v22, %v3569_v27 }
0x23fc   :  { %v2745_v44 = vpop.permute.xlu0 %2744 }
0x23fd   :  { %4313 = vmatmul.mubr.msk.f32.vlgmr.msra.gmra.mrb[22].mxu0 %vm155_vm2, %v2745_v44 }
0x23fe   :  { %4606 = vmatpush3.bf16.msra.mxu0 %v5005_v35  ;;  %4334 = vmatprep.mubr.msk.f32.mxu0 %vm4934_vm0, %v4935_v1 }
0x23ff   :  { %4607 = vmatprep.subr.bf16.mxu0 %v4933_v0 }
0x2402   :  { %4609 = vmatpush3.bf16.msra.mxu0 %v5008_v37 }
0x2403   :  { %4616 = vmatprep.subr.bf16.mxu0 %v4933_v0 }
0x2408   :  { %v2922_v45 = vpop.permute.xlu1 %2921 }
0x2409   :  { %4335 = vmatmul.mubr.msk.f32.vlgmr.msra.gmra.mrb[20].mxu0 %vm155_vm2, %v2922_v45 }
0x240a   :  { %4618 = vmatpush3.bf16.msra.mxu0 %v5026_v59  ;;  %4356 = vmatprep.mubr.msk.f32.mxu0 %vm4934_vm0, %v4935_v1 }
0x240b   :  { %4619 = vmatprep.subr.bf16.mxu0 %v4933_v0 }
0x240e   :  { %4621 = vmatpush3.bf16.msra.mxu0 %v5031_v4 }
0x240f   :  { %4628 = vmatprep.subr.bf16.mxu0 %v4933_v0 }
0x24dc   :  { %v2991_v47 = vpop.f32.mrb[20].mxu0 }
0x24dd   :  { %v4664_v28 = vadd.f32 %v5369_v38, %v2991_v47  ;;  %v4336_v42 = vpop.f32.mrb[21].mxu0 }
0x24df   :  { %4856 = vtanh.f32 %v4664_v28  ;;  %v3761_v50 = vmul.f32 -1.442695, %v4664_v28 }
0x24e1   :  { %4858 = vpow2.f32 %v3761_v50 }
0x24e9   :  { %v4857_v49 = vpop.eup %4856 }
0x24ea   :  { %3004 = vrot.lane.b32.xlu0 %v4857_v49, %s4936_s0 }
0x24eb   :  { %v4859_v52 = vpop.eup %4858 }
0x24ec   :  { %v2998_v40 = vadd.f32 1.0, %v4859_v52 }
0x24ee   :  { %4860 = vrcp.f32 %v2998_v40 }
0x24f8   :  { %v4861_v54 = vpop.eup %4860 }
0x24f9   :  { %v3002_v60 = vmul.f32 %v4861_v54, %v5375_v31 }
0x255c   :  { %v3005_v58 = vpop.permute.xlu0 %3004 }
0x255d   :  { %v3007_v18 = vmul.f32 %v4861_v54, %v3005_v58 }
0x255f   :  { %3009 = vrot.lane.b32.xlu1 %v3007_v18, %s4937_s29 }
0x25d1   :  { %v3010_v48 = vpop.permute.xlu1 %3009 }
0x25d2   :  { %v5442_v2 = vadd.f32 %v3010_v48, %v3002_v60 }
0x25d4   :  { %4862 = vtanh.f32 %v5442_v2 }
0x25de   :  { %v4863_v3 = vpop.eup %4862 }
0x25df   :  { %3015 = vrot.lane.b32.xlu0 %v4863_v3, %s4936_s0 }
0x2651   :  { %v3016_v41 = vpop.permute.xlu0 %3015 }
0x2652   :  { %v3018_v46 = vmul.f32 %v4861_v54, %v3016_v41 }
0x2654   :  { %3020 = vrot.lane.b32.xlu1 %v3018_v46, %s4937_s29 }
0x26c6   :  { %v3021_v9 = vpop.permute.xlu1 %3020 }
0x26c7   :  { %4346 = vmatmul.mubr.msk.f32.vlgmr.msra.gmra.mrb[20].mxu1 %vm155_vm2, %v3021_v9  ;;  %4357 = vmatmul.mubr.msk.f32.vlgmr.msra.gmra.mrb[22].mxu0 %vm155_vm2, %v3021_v9 }
0x26c8   :  { %4630 = vmatpush3.bf16.msra.mxu0 %v4976_v8  ;;  %4378 = vmatprep.mubr.msk.f32.mxu0 %vm4934_vm0, %v4935_v1 }
0x26c9   :  { %4631 = vmatprep.subr.bf16.mxu0 %v4933_v0  ;;  %4624 = vmatpush3.bf16.msra.mxu1 %v5077_v51 }
0x26ca   :  { %4625 = vmatprep.subr.bf16.mxu1 %v4933_v0  ;;  %4367 = vmatprep.mubr.msk.f32.mxu1 %vm4934_vm0, %v4935_v1 }
0x26cc   :  { %4633 = vmatpush3.bf16.msra.mxu0 %v4980_v12 }
0x26cd   :  { %4627 = vmatpush3.bf16.msra.mxu1 %v5080_v53 }
0x26ce   :  { %4634 = vmatprep.subr.bf16.mxu1 %v4933_v0 }
0x26cf   :  { %4379 = vmatmul.mubr.msk.f32.vlgmr.msra.gmra.mrb[24].mxu0 %vm155_vm2, %v2922_v45 }
0x279a   :  { %v3160_v8 = vpop.f32.mrb[22].mxu0 }
0x279b   :  { %v4665_v31 = vadd.f32 %v5401_v61, %v3160_v8  ;;  %v4358_v63 = vpop.f32.mrb[23].mxu0 }
0x279d   :  { %4864 = vtanh.f32 %v4665_v31  ;;  %v3764_v53 = vmul.f32 -1.442695, %v4665_v31 }
0x27a2   :  { %v3329_v11 = vpop.f32.mrb[24].mxu0 }
0x27a3   :  { %v3334_v51 = vrot.slane %v3329_v11, 2  ;;  %v4380_v10 = vpop.f32.mrb[25].mxu0 }
0x27a5   :  { %v3336_v5 = vadd.f32 %v3334_v51, %v4995_v16 }
0x27a7   :  { %v4865_v14 = vpop.eup %4864  ;;  %4866 = vtanh.f32 %v3336_v5  ;;  %v3767_v15 = vmul.f32 -1.442695, %v3336_v5  ;;  %v3585_v5 = vmax.f32 %v5287_v13, 0.0  ;;  %v64_v13 = vld [vmem:[%s5543_s2 + $0x10] sm:$0xff] }
0x27a8   :  { %3173 = vrot.lane.b32.xlu0 %v4865_v14, %s4936_s0  ;;  %4868 = vpow2.f32 %v3764_v53 }
0x27a9   :  { %4870 = vpow2.f32 %v3767_v15  ;;  %v62_v15 = vld [vmem:[%s5543_s2] sm:$0xff] }
0x27b1   :  { %v4867_v12 = vpop.eup %4866 }
0x27b2   :  { %3349 = vrot.lane.b32.xlu1 %v4867_v12, %s4936_s0  ;;  %v4869_v57 = vpop.eup %4868 }
0x27b3   :  { %v3167_v17 = vadd.f32 1.0, %v4869_v57  ;;  %v4871_v19 = vpop.eup %4870  ;;  %v63_v57 = vld [vmem:[%s5543_s2 + $0x8] sm:$0xff] }
0x27b4   :  { %v3340_v62 = vadd.f32 1.0, %v4871_v19  ;;  %v65_v19 = vld [vmem:[%s5543_s2 + $0x18] sm:$0xff] }
0x27b5   :  { %4872 = vrcp.f32 %v3167_v17  ;;  %v4646_v17 = vpack.c.bf16 %v63_v57, %v62_v15 }
0x27b6   :  { %4874 = vrcp.f32 %v3340_v62  ;;  %v4650_v62 = vpack.c.bf16 %v65_v19, %v64_v13 }
0x27b7   :  { %4647 = vmatprep.subr.bf16.mxu0 %v4646_v17 }
0x27b8   :  { %4649 = vmatpush3.bf16.msra.mxu0 %v4646_v17 }
0x27b9   :  { %4651 = vmatprep.subr.bf16.mxu0 %v4650_v62 }
0x27bc   :  { %4653 = vmatpush3.bf16.msra.mxu0 %v4650_v62 }
0x27bf   :  { %v4873_v23 = vpop.eup %4872 }
0x27c0   :  { %v4875_v55 = vpop.eup %4874  ;;  %v3171_v26 = vmul.f32 %v4873_v23, %v5410_v30 }
0x27c1   :  { %v3347_v25 = vmul.f32 %v4875_v55, %v3345_v32 }
0x281a   :  { %v3174_v24 = vpop.permute.xlu0 %3173 }
0x281b   :  { %v3176_v16 = vmul.f32 %v4873_v23, %v3174_v24 }
0x281d   :  { %3178 = vrot.lane.b32.xlu0 %v3176_v16, %s4937_s29 }
0x2824   :  { %v3350_v7 = vpop.permute.xlu1 %3349 }
0x2825   :  { %v3352_v6 = vmul.f32 %v4875_v55, %v3350_v7 }
0x2827   :  { %3354 = vrot.lane.b32.xlu1 %v3352_v6, %s4937_s29 }
0x288f   :  { %v3179_v29 = vpop.permute.xlu0 %3178 }
0x2890   :  { %v5468_v20 = vadd.f32 %v3179_v29, %v3171_v26  ;;  %v3772_v29 = vld [vmem:[%s5543_s2 + $0x20] ss:$0 sm:$0xff] }
0x2892   :  { %4876 = vtanh.f32 %v5468_v20 }
0x2899   :  { %v3355_v21 = vpop.permute.xlu1 %3354 }
0x289a   :  { %v3357_v34 = vadd.f32 %v3355_v21, %v3347_v25 }
0x289c   :  { %v4877_v56 = vpop.eup %4876  ;;  %4878 = vtanh.f32 %v3357_v34 }
0x289d   :  { %3184 = vrot.lane.b32.xlu0 %v4877_v56, %s4936_s0 }
0x28a6   :  { %v4879_v39 = vpop.eup %4878 }
0x28a7   :  { %3360 = vrot.lane.b32.xlu1 %v4879_v39, %s4936_s0 }
0x290f   :  { %v3185_v30 = vpop.permute.xlu0 %3184 }
0x2910   :  { %v3187_v43 = vmul.f32 %v4873_v23, %v3185_v30 }
0x2912   :  { %v3571_v44 = vrot.slane %v3187_v43, 4  ;;  %3189 = vrot.lane.b32.xlu0 %v3187_v43, %s4937_s29 }
0x2914   :  { %v5479_v45 = vsel %vm3578_vm4, %v3582_v33, %v3571_v44 }
0x2919   :  { %v3361_v47 = vpop.permute.xlu1 %3360 }
0x291a   :  { %v3363_v28 = vmul.f32 %v4875_v55, %v3361_v47 }
0x291c   :  { %v3365_v42 = vrot.slane %v3363_v28, 6 }
0x291e   :  { %3366 = vrot.lane.b32.xlu1 %v3365_v42, %s4937_s29 }
0x2984   :  { %v3190_v49 = vpop.permute.xlu0 %3189 }
0x2985   :  { %4368 = vmatmul.mubr.msk.f32.vlgmr.msra.gmra.mrb[22].mxu1 %vm155_vm2, %v3190_v49 }
0x2986   :  { %4636 = vmatpush3.bf16.msra.mxu1 %v5005_v35  ;;  %4389 = vmatprep.mubr.msk.f32.mxu1 %vm4934_vm0, %v4935_v1 }
0x2987   :  { %4637 = vmatprep.subr.bf16.mxu1 %v4933_v0 }
0x298a   :  { %4639 = vmatpush3.bf16.msra.mxu1 %v5008_v37 }
0x298b   :  { %4640 = vmatprep.subr.bf16.mxu1 %v4933_v0 }
0x2990   :  { %v3367_v22 = vpop.permute.xlu1 %3366 }
0x2991   :  { %4390 = vmatmul.mubr.msk.f32.vlgmr.msra.gmra.mrb[20].mxu1 %vm155_vm2, %v3367_v22 }
0x2992   :  { %4642 = vmatpush3.bf16.msra.mxu1 %v5026_v59  ;;  %4400 = vmatprep.mubr.msk.f32.mxu1 %vm4934_vm0, %v4935_v1 }
0x2993   :  { %4643 = vmatprep.subr.bf16.mxu1 %v4933_v0 }
0x2996   :  { %4645 = vmatpush3.bf16.msra.mxu1 %v5031_v4 }
0x2a64   :  { %v3436_v35 = vpop.f32.mrb[20].mxu1 }
0x2a65   :  { %v4666_v36 = vadd.f32 %v5369_v38, %v3436_v35  ;;  %v4391_v50 = vpop.f32.mrb[21].mxu1 }
0x2a67   :  { %4880 = vtanh.f32 %v4666_v36  ;;  %v3769_v52 = vmul.f32 -1.442695, %v4666_v36 }
0x2a69   :  { %4882 = vpow2.f32 %v3769_v52 }
0x2a71   :  { %v4881_v37 = vpop.eup %4880 }
0x2a72   :  { %3449 = vrot.lane.b32.xlu0 %v4881_v37, %s4936_s0 }
0x2a73   :  { %v4883_v40 = vpop.eup %4882 }
0x2a74   :  { %v3443_v54 = vadd.f32 1.0, %v4883_v40 }
0x2a76   :  { %4884 = vrcp.f32 %v3443_v54 }
0x2a80   :  { %v4885_v59 = vpop.eup %4884 }
0x2a81   :  { %v3447_v0 = vmul.f32 %v4885_v59, %v5442_v2 }
0x2ae4   :  { %v3450_v58 = vpop.permute.xlu0 %3449 }
0x2ae5   :  { %v3452_v1 = vmul.f32 %v4885_v59, %v3450_v58 }
0x2ae7   :  { %3454 = vrot.lane.b32.xlu1 %v3452_v1, %s4937_s29 }
0x2b59   :  { %v3455_v4 = vpop.permute.xlu1 %3454 }
0x2b5a   :  { %v3457_v18 = vadd.f32 %v3455_v4, %v3447_v0 }
0x2b5c   :  { %4886 = vtanh.f32 %v3457_v18 }
0x2b66   :  { %v4887_v38 = vpop.eup %4886 }
0x2b67   :  { %3460 = vrot.lane.b32.xlu0 %v4887_v38, %s4936_s0 }
0x2bd9   :  { %v3461_v60 = vpop.permute.xlu0 %3460 }
0x2bda   :  { %v3463_v48 = vmul.f32 %v4885_v59, %v3461_v60 }
0x2bdc   :  { %3465 = vrot.lane.b32.xlu1 %v3463_v48, %s4937_s29 }
0x2c4e   :  { %v3466_v3 = vpop.permute.xlu1 %3465 }
0x2c4f   :  { %4401 = vmatmul.mubr.msk.f32.vlgmr.msra.gmra.mrb[22].mxu1 %vm155_vm2, %v3466_v3 }
0x2d22   :  { %v3535_v41 = vpop.f32.mrb[22].mxu1 }
0x2d23   :  { %v4667_v46 = vadd.f32 %v5401_v61, %v3535_v41  ;;  %v4402_v9 = vpop.f32.mrb[23].mxu1 }
0x2d25   :  { %4888 = vtanh.f32 %v4667_v46  ;;  %v3771_v2 = vmul.f32 -1.442695, %v4667_v46 }
0x2d27   :  { %4890 = vpow2.f32 %v3771_v2 }
0x2d2f   :  { %v4889_v8 = vpop.eup %4888 }
0x2d30   :  { %3548 = vrot.lane.b32.xlu0 %v4889_v8, %s4936_s0 }
0x2d31   :  { %v4891_v31 = vpop.eup %4890 }
0x2d32   :  { %v3542_v63 = vadd.f32 1.0, %v4891_v31 }
0x2d34   :  { %4892 = vrcp.f32 %v3542_v63 }
0x2d3e   :  { %v4893_v11 = vpop.eup %4892 }
0x2d3f   :  { %v3546_v61 = vmul.f32 %v4893_v11, %v5468_v20 }
0x2da2   :  { %v3549_v51 = vpop.permute.xlu0 %3548 }
0x2da3   :  { %v3551_v10 = vmul.f32 %v4893_v11, %v3549_v51 }
0x2da5   :  { %3553 = vrot.lane.b32.xlu1 %v3551_v10, %s4937_s29 }
0x2da9   :  { %3593 = vrot.lane.b32.xlu1 %v3585_v5, %s4937_s29 }
0x2e17   :  { %v3554_v14 = vpop.permute.xlu1 %3553 }
0x2e18   :  { %v3556_v12 = vadd.f32 %v3554_v14, %v3546_v61 }
0x2e1a   :  { %4894 = vtanh.f32 %v3556_v12 }
0x2e1b   :  { %v3594_v53 = vpop.permute.xlu1 %3593 }
0x2e1c   :  { %4411 = vmatprep.mubr.msk.f32.mxu0 %vm155_vm2, %v3594_v53 }
0x2e24   :  { %v4895_v23 = vpop.eup %4894 }
0x2e25   :  { %3559 = vrot.lane.b32.xlu0 %v4895_v23, %s4936_s0 }
0x2e97   :  { %v3560_v24 = vpop.permute.xlu0 %3559 }
0x2e98   :  { %v3562_v16 = vmul.f32 %v4893_v11, %v3560_v24 }
0x2e9a   :  { %v3574_v55 = vrot.slane %v3562_v16, 2 }
0x2e9c   :  { %v3584_v7 = vsel %vm3580_vm5, %v5479_v45, %v3574_v55 }
0x2e9d   :  { %v3586_v6 = vmax.f32 %v3584_v7, 0.0 }
0x2e9f   :  { %3595 = vrot.lane.b32.xlu0 %v3586_v6, %s4937_s29 }
0x2f11   :  { %v3596_v26 = vpop.permute.xlu0 %3595 }
0x2f12   :  { %4412 = vmatmul.mubr.msk.f32.vlgmr.msra.gmra.mrb[26].mxu0 %vm155_vm2, %v3596_v26 }
0x2fe5   :  { %v4413_v20 = vpop.f32.mrb[26].mxu0 }
0x2fe6   :  { %v3673_v32 = vadd.f32 %v4413_v20, %v3772_v29  ;;  %v3667_v25 = vpop.f32.mrb[27].mxu0 }
0x2fe7   :  { %v3668_v21 = vadd.f32 %v3772_v29, %v3667_v25 }
0x2fe8   :  { %v3680_v34 = vsel %vm3676_vm6, %v3673_v32, -inf }
0x2fe9   :  { %3681 = vmax.xlane.f32.xlu0 %v3680_v34  ;;  %v3677_v56 = vsel %vm3676_vm6, %v3668_v21, -inf }
0x2fea   :  { %3678 = vmax.xlane.f32.xlu1 %v3677_v56 }
0x3076   :  { %v3682_v39 = vpop.xlane.xlu0 %3681 }
0x3077   :  { %v3684_v27 = vsub.f32 %v3673_v32, %v3682_v39  ;;  %v3679_v30 = vpop.xlane.xlu1 %3678 }
0x3078   :  { %v3683_v43 = vsub.f32 %v3668_v21, %v3679_v30 }
0x3079   :  { %v3687_v44 = vmul.f32 1.442695, %v3684_v27 }
0x307a   :  { %v3685_v33 = vmul.f32 1.442695, %v3683_v43 }
0x307b   :  { %4896 = vpow2.f32 %v3687_v44 }
0x307c   :  { %4898 = vpow2.f32 %v3685_v33 }
0x3085   :  { %v4897_v45 = vpop.eup %4896 }
0x3086   :  { %v4899_v47 = vpop.eup %4898  ;;  %v3692_v28 = vsel %vm3676_vm6, %v4897_v45, 0.0 }
0x3087   :  { %3693 = vadd.xlane.f32.xlu1 %v3692_v28  ;;  %v3689_v42 = vsel %vm3676_vm6, %v4899_v47, 0.0 }
0x3088   :  { %3690 = vadd.xlane.f32.xlu0 %v3689_v42 }
0x3114   :  { %v3694_v49 = vpop.xlane.xlu1 %3693 }
0x3115   :  { %4900 = vrcp.f32 %v3694_v49  ;;  %v3691_v22 = vpop.xlane.xlu0 %3690 }
0x3116   :  { %4902 = vrcp.f32 %v3691_v22 }
0x311f   :  { %v4901_v35 = vpop.eup %4900 }
0x3120   :  { %v4903_v36 = vpop.eup %4902  ;;  %v3698_v50 = vmul.f32 %v4901_v35, %v4897_v45 }
0x3121   :  { %v3696_v37 = vmul.f32 %v4903_v36, %v4899_v47 }
0x3122   :  { %3700 = vst.msk [vmem:[%s5544_s3 + $0x8] sm:$0xff] %vm3676_vm6, %v3698_v50 }
0x3123   :  { %3699 = vst.msk [vmem:[%s5544_s3] sm:$0xff] %vm3676_vm6, %v3696_v37 }
0x3124   :  { %3705 = vsyncpa [#allocation3], 1 }

</bundles_post_ra>
